<compile_context>
chip_gen: v7x
topology: tpu7x:2x2x1
jax: 0.10.0
libtpu: 0.0.40
codegen_flags: <defaults>
</compile_context>

<pallas_src>
import functools

import jax
import jax.numpy as jnp
from jax.experimental import pallas as pl
from jax.experimental.pallas import tpu as pltpu


def vae_kernel(
    x_ref, eps_ref,
    w1_ref, w2h_ref, wd1_ref, wd2_ref,
    b_ref,
    recon_ref, heads_ref,
    *, hidden_dim, latent_dim, output_dim,
):
    H, L, O = hidden_dim, latent_dim, output_dim
    # Static offsets into the packed bias row: [b1 | b2h | bd1 | bd2]
    o1 = 0
    o2h = o1 + H
    od1 = o2h + 2 * L
    od2 = od1 + H

    def mm(a_f32, w_ref):
        # bf16 matmul operands, f32 accumulation on the MXU.
        return jnp.dot(a_f32.astype(jnp.bfloat16), w_ref[...],
                       preferred_element_type=jnp.float32)

    x = x_ref[...]                                                   # (tm, in) bf16/f32

    # ----- encoder (Linear+ReLU, then folded Linear2 @ [mu|log_var] heads) -----
    h = jnp.maximum(mm(x, w1_ref) + b_ref[:, o1:o1 + H], 0.0)
    heads = mm(h, w2h_ref) + b_ref[:, o2h:o2h + 2 * L]               # (tm, 2L) f32
    heads_ref[...] = heads

    mu = heads[:, :L]
    log_var = heads[:, L:]

    # ----- reparameterize: z = mu + eps * exp(0.5 * log_var) -----
    z = mu + eps_ref[...] * jnp.exp(0.5 * log_var)

    # ----- decoder -----
    hd = jnp.maximum(mm(z, wd1_ref) + b_ref[:, od1:od1 + H], 0.0)
    logits = mm(hd, wd2_ref) + b_ref[:, od2:od2 + O]
    # sigmoid = 1 / (1 + exp(-x)); approx reciprocal runs on the EUP slot.
    recon = pl.reciprocal(1.0 + jnp.exp(-logits), approx=True)
    recon_ref[...] = recon.astype(recon_ref.dtype)


def _pick_tm(B, tm):
    """Largest pow2 tile <= 512 dividing B that still leaves >= 2 grid steps."""
    if tm is not None:
        assert B % tm == 0, "batch must be a multiple of the row tile"
        return tm
    cand = 512
    while cand >= 16:
        if B % cand == 0 and B // cand >= 2:
            return cand
        cand //= 2
    return B  # tiny batch: single grid step


def vae_forward(x, eps, params, *, tm=None):
    """Full VAE forward: returns (reconstruction, mu, log_var)."""
    B, input_dim = x.shape
    hidden_dim = params["w1"].shape[1]
    latent_dim = params["w2h"].shape[1] // 2
    output_dim = params["wd2"].shape[1]
    tm = _pick_tm(B, tm)

    # Pack all biases into one lane-aligned row -> single operand / single DMA.
    bias = jnp.concatenate(
        [params["b1"], params["b2h"], params["bd1"], params["bd2"]], axis=1)

    flops = 2 * B * (
        input_dim * hidden_dim
        + hidden_dim * 2 * latent_dim
        + latent_dim * hidden_dim
        + hidden_dim * output_dim
    )
    transcendentals = B * (latent_dim + output_dim)  # exp in reparam + sigmoid
    bytes_accessed = (
        x.size * x.dtype.itemsize + eps.size * eps.dtype.itemsize
        + bias.size * 4
        + sum(params[k].size * 2 for k in ("w1", "w2h", "wd1", "wd2"))
        + B * output_dim * x.dtype.itemsize + B * 2 * latent_dim * 4
    )

    kernel = functools.partial(
        vae_kernel,
        hidden_dim=hidden_dim, latent_dim=latent_dim, output_dim=output_dim,
    )

    # Constant index_map -> operand stays VMEM-resident across grid steps.
    resident = lambda shape: pl.BlockSpec(shape, lambda i: (0, 0))

    recon, heads = pl.pallas_call(
        kernel,
        grid=(B // tm,),
        in_specs=[
            pl.BlockSpec((tm, input_dim), lambda i: (i, 0)),    # x tile (streamed)
            pl.BlockSpec((tm, latent_dim), lambda i: (i, 0)),   # eps tile
            resident(params["w1"].shape),
            resident(params["w2h"].shape),
            resident(params["wd1"].shape),
            resident(params["wd2"].shape),
            resident(bias.shape),                               # packed biases
        ],
        out_specs=(
            pl.BlockSpec((tm, output_dim), lambda i: (i, 0)),       # recon
            pl.BlockSpec((tm, 2 * latent_dim), lambda i: (i, 0)),   # mu|log_var
        ),
        out_shape=(
            jax.ShapeDtypeStruct((B, output_dim), x.dtype),
            jax.ShapeDtypeStruct((B, 2 * latent_dim), jnp.float32),
        ),
        compiler_params=pltpu.CompilerParams(
            dimension_semantics=("parallel",),
        ),
        cost_estimate=pl.CostEstimate(
            flops=flops,
            transcendentals=transcendentals,
            bytes_accessed=bytes_accessed,
        ),
    )(x, eps, params["w1"], params["w2h"], params["wd1"], params["wd2"], bias)

    mu = heads[:, :latent_dim]
    log_var = heads[:, latent_dim:]
    return recon, mu, log_var


def init_params(key, input_dim, hidden_dim, latent_dim):
    """PyTorch-style Linear init.  Encoder Linear-2 is folded into the fused
    mu|log_var head (fold done in f32, cast to bf16 once)."""
    ks = jax.random.split(key, 12)

    def lin(kw, kb, fan_in, fan_out):
        bound = 1.0 / (fan_in ** 0.5)
        w = jax.random.uniform(kw, (fan_in, fan_out), jnp.float32, -bound, bound)
        b = jax.random.uniform(kb, (1, fan_out), jnp.float32, -bound, bound)
        return w, b

    w1, b1 = lin(ks[0], ks[1], input_dim, hidden_dim)       # encoder Linear 1
    w2, b2 = lin(ks[2], ks[3], hidden_dim, latent_dim)      # encoder Linear 2
    wmu, bmu = lin(ks[4], ks[5], latent_dim, latent_dim)    # mu head
    wlv, blv = lin(ks[6], ks[7], latent_dim, latent_dim)    # log_var head
    wd1, bd1 = lin(ks[8], ks[9], latent_dim, hidden_dim)    # decoder Linear 1
    wd2, bd2 = lin(ks[10], ks[11], hidden_dim, input_dim)   # decoder Linear 2

    # Fused heads [mu | log_var], then fold Linear-2 into them (f32 math):
    #   heads(h) = (h @ W2 + b2) @ Wh + bh = h @ (W2 @ Wh) + (b2 @ Wh + bh)
    wh = jnp.concatenate([wmu, wlv], axis=1)                 # (L, 2L)
    bh = jnp.concatenate([bmu, blv], axis=1)                 # (1, 2L)
    w2h = w2 @ wh                                            # (H, 2L) f32
    b2h = b2 @ wh + bh                                       # (1, 2L) f32

    to_bf16 = lambda w: w.astype(jnp.bfloat16)
    return dict(
        w1=to_bf16(w1), b1=b1,
        w2h=to_bf16(w2h), b2h=b2h,
        wd1=to_bf16(wd1), bd1=bd1,
        wd2=to_bf16(wd2), bd2=bd2,
    )


def reference(x, eps, p, latent_dim):
    """Pure-JAX reference mirroring the kernel's bf16-operand / f32-accum math."""
    def mm(a, w):
        return jnp.dot(a.astype(jnp.bfloat16), w, preferred_element_type=jnp.float32)

    h = jnp.maximum(mm(x, p["w1"]) + p["b1"], 0.0)
    heads = mm(h, p["w2h"]) + p["b2h"]
    mu, log_var = heads[:, :latent_dim], heads[:, latent_dim:]
    z = mu + eps * jnp.exp(0.5 * log_var)
    hd = jnp.maximum(mm(z, p["wd1"]) + p["bd1"], 0.0)
    recon = jax.nn.sigmoid(mm(hd, p["wd2"]) + p["bd2"])
    return recon, mu, log_var


if __name__ == "__main__":
    # Small shapes consistent with the module (lane-aligned); tm auto-picks 128
    # so the grid has 2 steps (keeps both v7x TensorCores busy).
    B, input_dim, hidden_dim, latent_dim = 256, 512, 256, 128

    key = jax.random.PRNGKey(0)
    kx, ke, kp = jax.random.split(key, 3)
    # x streamed in bf16 (dominant HBM traffic); eps / elementwise math in f32.
    x = jax.random.normal(kx, (B, input_dim), jnp.float32).astype(jnp.bfloat16)
    eps = jax.random.normal(ke, (B, latent_dim), jnp.float32)  # torch.randn_like(std)
    params = init_params(kp, input_dim, hidden_dim, latent_dim)

    recon, mu, log_var = jax.jit(vae_forward)(x, eps, params)
    jax.block_until_ready((recon, mu, log_var))

    r_ref, mu_ref, lv_ref = reference(x, eps, params, latent_dim)
    assert recon.shape == (B, input_dim)
    assert mu.shape == (B, latent_dim) and log_var.shape == (B, latent_dim)
    assert jnp.allclose(mu, mu_ref, atol=2e-2, rtol=2e-2)
    assert jnp.allclose(log_var, lv_ref, atol=2e-2, rtol=2e-2)
    assert jnp.allclose(recon.astype(jnp.float32), r_ref, atol=2e-2, rtol=2e-2)

    print("KERNEL_OK")
</pallas_src>

<mosaic_0001>
module attributes {stable_mosaic.version = 11 : i64} {
  func.func @vae_kernel(%arg0: i32, %arg1: memref<128x512xbf16, #tpu.memory_space<vmem>>, %arg2: memref<128x128xf32, #tpu.memory_space<vmem>>, %arg3: memref<512x256xbf16, #tpu.memory_space<vmem>>, %arg4: memref<256x256xbf16, #tpu.memory_space<vmem>>, %arg5: memref<128x256xbf16, #tpu.memory_space<vmem>>, %arg6: memref<256x512xbf16, #tpu.memory_space<vmem>>, %arg7: memref<1x1280xf32, #tpu.memory_space<vmem>>, %arg8: memref<128x512xbf16, #tpu.memory_space<vmem>>, %arg9: memref<128x256xf32, #tpu.memory_space<vmem>>) attributes {dimension_semantics = [#tpu.dimension_semantics<parallel>], iteration_bounds = array<i64: 2>, scalar_prefetch = 0 : i64, scratch_operands = 0 : i64, tpu.core_type = #tpu.core_type<tc>, window_params = [{transform_indices = @transform_0, window_bounds = array<i64: 128, 512>}, {transform_indices = @transform_1, window_bounds = array<i64: 128, 128>}, {pipeline_mode = #tpu.pipeline_mode<synchronous>, transform_indices = @transform_2, window_bounds = array<i64: 512, 256>}, {pipeline_mode = #tpu.pipeline_mode<synchronous>, transform_indices = @transform_3, window_bounds = array<i64: 256, 256>}, {pipeline_mode = #tpu.pipeline_mode<synchronous>, transform_indices = @transform_4, window_bounds = array<i64: 128, 256>}, {pipeline_mode = #tpu.pipeline_mode<synchronous>, transform_indices = @transform_5, window_bounds = array<i64: 256, 512>}, {pipeline_mode = #tpu.pipeline_mode<synchronous>, transform_indices = @transform_6, window_bounds = array<i64: 1, 1280>}, {transform_indices = @transform_7, window_bounds = array<i64: 128, 512>}, {transform_indices = @transform_8, window_bounds = array<i64: 128, 256>}]} {
    %c0 = arith.constant 0 : index
    %c0_0 = arith.constant 0 : index
    %0 = vector.load %arg1[%c0, %c0_0] : memref<128x512xbf16, #tpu.memory_space<vmem>>, vector<128x512xbf16>
    %c0_1 = arith.constant 0 : index
    %c0_2 = arith.constant 0 : index
    %1 = vector.load %arg3[%c0_1, %c0_2] : memref<512x256xbf16, #tpu.memory_space<vmem>>, vector<512x256xbf16>
    %cst = arith.constant dense<0.000000e+00> : vector<128x256xf32>
    %2 = tpu.matmul %0, %1, %cst {dimension_numbers = #tpu.dot_dimension_numbers<[1], [0], [0], [1], [0, 0, 1, 1], [], []>} : vector<128x512xbf16>, vector<512x256xbf16>, vector<128x256xf32> -> vector<128x256xf32>
    %c0_3 = arith.constant 0 : index
    %c0_4 = arith.constant 0 : index
    %3 = vector.load %arg7[%c0_3, %c0_4] : memref<1x1280xf32, #tpu.memory_space<vmem>>, vector<1x256xf32>
    %4 = vector.broadcast %3 : vector<1x256xf32> to vector<128x256xf32>
    %5 = arith.addf %2, %4 : vector<128x256xf32>
    %cst_5 = arith.constant 0.000000e+00 : f32
    %6 = vector.broadcast %cst_5 : f32 to vector<128x256xf32>
    %7 = arith.maximumf %5, %6 : vector<128x256xf32>
    %8 = arith.truncf %7 : vector<128x256xf32> to vector<128x256xbf16>
    %c0_6 = arith.constant 0 : index
    %c0_7 = arith.constant 0 : index
    %9 = vector.load %arg4[%c0_6, %c0_7] : memref<256x256xbf16, #tpu.memory_space<vmem>>, vector<256x256xbf16>
    %cst_8 = arith.constant dense<0.000000e+00> : vector<128x256xf32>
    %10 = tpu.matmul %8, %9, %cst_8 {dimension_numbers = #tpu.dot_dimension_numbers<[1], [0], [0], [1], [0, 0, 1, 1], [], []>} : vector<128x256xbf16>, vector<256x256xbf16>, vector<128x256xf32> -> vector<128x256xf32>
    %c0_9 = arith.constant 0 : index
    %c256 = arith.constant 256 : index
    %11 = vector.load %arg7[%c0_9, %c256] : memref<1x1280xf32, #tpu.memory_space<vmem>>, vector<1x256xf32>
    %12 = vector.broadcast %11 : vector<1x256xf32> to vector<128x256xf32>
    %13 = arith.addf %10, %12 : vector<128x256xf32>
    %c0_10 = arith.constant 0 : index
    %c0_11 = arith.constant 0 : index
    %14 = vector.load %arg9[%c0_10, %c0_11] : memref<128x256xf32, #tpu.memory_space<vmem>>, vector<128x256xf32>
    tpu.vector_store %arg9[%c0_10, %c0_11], %13 {strides = array<i32>} : memref<128x256xf32, #tpu.memory_space<vmem>>, vector<128x256xf32>,
    %15 = vector.extract_strided_slice %13 {offsets = [0, 0], sizes = [128, 128], strides = [1, 1]} : vector<128x256xf32> to vector<128x128xf32>
    %16 = vector.extract_strided_slice %13 {offsets = [0, 128], sizes = [128, 128], strides = [1, 1]} : vector<128x256xf32> to vector<128x128xf32>
    %c0_12 = arith.constant 0 : index
    %c0_13 = arith.constant 0 : index
    %17 = vector.load %arg2[%c0_12, %c0_13] : memref<128x128xf32, #tpu.memory_space<vmem>>, vector<128x128xf32>
    %cst_14 = arith.constant 5.000000e-01 : f32
    %18 = vector.broadcast %cst_14 : f32 to vector<128x128xf32>
    %19 = arith.mulf %18, %16 : vector<128x128xf32>
    %20 = math.exp %19 : vector<128x128xf32>
    %21 = arith.mulf %17, %20 : vector<128x128xf32>
    %22 = arith.addf %15, %21 : vector<128x128xf32>
    %23 = arith.truncf %22 : vector<128x128xf32> to vector<128x128xbf16>
    %c0_15 = arith.constant 0 : index
    %c0_16 = arith.constant 0 : index
    %24 = vector.load %arg5[%c0_15, %c0_16] : memref<128x256xbf16, #tpu.memory_space<vmem>>, vector<128x256xbf16>
    %cst_17 = arith.constant dense<0.000000e+00> : vector<128x256xf32>
    %25 = tpu.matmul %23, %24, %cst_17 {dimension_numbers = #tpu.dot_dimension_numbers<[1], [0], [0], [1], [0, 0, 1, 1], [], []>} : vector<128x128xbf16>, vector<128x256xbf16>, vector<128x256xf32> -> vector<128x256xf32>
    %c0_18 = arith.constant 0 : index
    %c512 = arith.constant 512 : index
    %26 = vector.load %arg7[%c0_18, %c512] : memref<1x1280xf32, #tpu.memory_space<vmem>>, vector<1x256xf32>
    %27 = vector.broadcast %26 : vector<1x256xf32> to vector<128x256xf32>
    %28 = arith.addf %25, %27 : vector<128x256xf32>
    %cst_19 = arith.constant 0.000000e+00 : f32
    %29 = vector.broadcast %cst_19 : f32 to vector<128x256xf32>
    %30 = arith.maximumf %28, %29 : vector<128x256xf32>
    %31 = arith.truncf %30 : vector<128x256xf32> to vector<128x256xbf16>
    %c0_20 = arith.constant 0 : index
    %c0_21 = arith.constant 0 : index
    %32 = vector.load %arg6[%c0_20, %c0_21] : memref<256x512xbf16, #tpu.memory_space<vmem>>, vector<256x512xbf16>
    %cst_22 = arith.constant dense<0.000000e+00> : vector<128x512xf32>
    %33 = tpu.matmul %31, %32, %cst_22 {dimension_numbers = #tpu.dot_dimension_numbers<[1], [0], [0], [1], [0, 0, 1, 1], [], []>} : vector<128x256xbf16>, vector<256x512xbf16>, vector<128x512xf32> -> vector<128x512xf32>
    %c0_23 = arith.constant 0 : index
    %c768 = arith.constant 768 : index
    %34 = vector.load %arg7[%c0_23, %c768] : memref<1x1280xf32, #tpu.memory_space<vmem>>, vector<1x512xf32>
    %35 = vector.broadcast %34 : vector<1x512xf32> to vector<128x512xf32>
    %36 = arith.addf %33, %35 : vector<128x512xf32>
    %cst_24 = arith.constant 0.000000e+00 : f32
    %37 = vector.broadcast %cst_24 : f32 to vector<128x512xf32>
    %38 = arith.subf %37, %36 : vector<128x512xf32>
    %39 = math.exp %38 : vector<128x512xf32>
    %cst_25 = arith.constant 1.000000e+00 : f32
    %40 = vector.broadcast %cst_25 : f32 to vector<128x512xf32>
    %41 = arith.addf %40, %39 : vector<128x512xf32>
    %42 = tpu.reciprocal %41 {approx = true} : vector<128x512xf32> -> vector<128x512xf32>
    %43 = arith.truncf %42 : vector<128x512xf32> to vector<128x512xbf16>
    %c0_26 = arith.constant 0 : index
    %c0_27 = arith.constant 0 : index
    %44 = vector.load %arg8[%c0_26, %c0_27] : memref<128x512xbf16, #tpu.memory_space<vmem>>, vector<128x512xbf16>
    tpu.vector_store %arg8[%c0_26, %c0_27], %43 {strides = array<i32>} : memref<128x512xbf16, #tpu.memory_space<vmem>>, vector<128x512xbf16>,
    return
  }
  func.func @transform_0(%arg0: i32) -> (i32, i32) {
    %c0_i32 = arith.constant 0 : i32
    %c0_i32_0 = arith.constant 0 : i32
    return %arg0, %c0_i32 : i32, i32
  }
  func.func @transform_1(%arg0: i32) -> (i32, i32) {
    %c0_i32 = arith.constant 0 : i32
    %c0_i32_0 = arith.constant 0 : i32
    return %arg0, %c0_i32 : i32, i32
  }
  func.func @transform_2(%arg0: i32) -> (i32, i32) {
    %c0_i32 = arith.constant 0 : i32
    %c0_i32_0 = arith.constant 0 : i32
    %c0_i32_1 = arith.constant 0 : i32
    return %c0_i32, %c0_i32_0 : i32, i32
  }
  func.func @transform_3(%arg0: i32) -> (i32, i32) {
    %c0_i32 = arith.constant 0 : i32
    %c0_i32_0 = arith.constant 0 : i32
    %c0_i32_1 = arith.constant 0 : i32
    return %c0_i32, %c0_i32_0 : i32, i32
  }
  func.func @transform_4(%arg0: i32) -> (i32, i32) {
    %c0_i32 = arith.constant 0 : i32
    %c0_i32_0 = arith.constant 0 : i32
    %c0_i32_1 = arith.constant 0 : i32
    return %c0_i32, %c0_i32_0 : i32, i32
  }
  func.func @transform_5(%arg0: i32) -> (i32, i32) {
    %c0_i32 = arith.constant 0 : i32
    %c0_i32_0 = arith.constant 0 : i32
    %c0_i32_1 = arith.constant 0 : i32
    return %c0_i32, %c0_i32_0 : i32, i32
  }
  func.func @transform_6(%arg0: i32) -> (i32, i32) {
    %c0_i32 = arith.constant 0 : i32
    %c0_i32_0 = arith.constant 0 : i32
    %c0_i32_1 = arith.constant 0 : i32
    return %c0_i32, %c0_i32_0 : i32, i32
  }
  func.func @transform_7(%arg0: i32) -> (i32, i32) {
    %c0_i32 = arith.constant 0 : i32
    %c0_i32_0 = arith.constant 0 : i32
    return %arg0, %c0_i32 : i32, i32
  }
  func.func @transform_8(%arg0: i32) -> (i32, i32) {
    %c0_i32 = arith.constant 0 : i32
    %c0_i32_0 = arith.constant 0 : i32
    return %arg0, %c0_i32 : i32, i32
  }
}

</mosaic_0001>

<bundles_post_ra>
// kernel: vae_forward.1
= control target key start
LH: loop header
LB: loop body
LE: loop exit
PB: predicated region body
PF: predicated region fallthrough
CT: control target
= control target key end

     0   :  { %s5648_s0 = inlined_call_operand.hbm [shape: bf16[256,512], index: 0, kind: input, shape index: {}]   ;;  %s5649_s1 = inlined_call_operand.hbm [shape: f32[256,128], index: 1, kind: input, shape index: {}]   ;;  %s5650_s2 = inlined_call_operand.hbm [shape: bf16[512,256], index: 2, kind: input, shape index: {}]   ;;  %s5651_s3 = inlined_call_operand.hbm [shape: bf16[256,256], index: 3, kind: input, shape index: {}]   ;;  %s5652_s4 = inlined_call_operand.hbm [shape: bf16[128,256], index: 4, kind: input, shape index: {}]   ;;  %s5653_s5 = inlined_call_operand.hbm [shape: bf16[256,512], index: 5, kind: input, shape index: {}]   ;;  %s5654_s6 = inlined_call_operand.vmem [shape: f32[1,1280], index: 6, kind: input, shape index: {}]   ;;  %s5655_s7 = inlined_call_operand.hbm [shape: bf16[256,512], index: 7, kind: output, shape index: {0}]   ;;  %s5656_s8 = inlined_call_operand.vmem [shape: f32[256,256], index: 8, kind: output, shape index: {1}]  }
   0x1   :  { %5666 = sst [smem:[#allocation22_spill]] %s5648_s0 }
   0x2   :  { %5667 = sst [smem:[#allocation23_spill]] %s5650_s2 }
   0x3   :  { %5668 = sst [smem:[#allocation24_spill]] %s5651_s3 }
   0x4   :  { %5669 = sst [smem:[#allocation25_spill]] %s5652_s4 }
   0x5   :  { %14 = vsyncpa [#allocation3], 0 }
   0x6   :  { %16 = vsyncpa [#allocation3 + $0x1], 0 }
   0x7   :  { %17 = vsyncpa [#allocation6], 0 }
   0x8   :  { %19 = vsyncpa [#allocation6 + $0x1], 0 }
   0x9   :  { %20 = vsyncpa [#allocation9], 0 }
   0xa   :  { %21 = vsyncpa [#allocation12], 0 }
   0xb   :  { %22 = vsyncpa [#allocation4], 0 }
   0xc   :  { %24 = vsyncpa [#allocation4 + $0x1], 0  ;;  %s4775_s27 = smov 0   ;;  %s4777_s28 = smov 0  }
   0xd   :  { %s4779_s29 = smov 0   ;;  %s4781_s30 = smov 0  }
   0xe LB: > { %5670 = sst [smem:[#allocation20_spill]] %s4702_s27  ;;  %s4796_s9 = sadd.s32 4294967295, %s4714_s30   ;;  %s4714_s30 = sphi %s4781_s30, %s5704_s30   ;;  %s4710_s29 = sphi %s4779_s29, %s5703_s29   ;;  %s4706_s28 = sphi %s4777_s28, %s5702_s28   ;;  %s4702_s27 = sphi %s4775_s27, %s5701_s27  }
   0xf   : > { %s3388_s10 = sadd.s32 4294967294, %s4714_s30   ;;  %p50_p0 = scmp.ne.s32.totalorder %s4706_s28, %s4702_s27 }
  0x10   : > { %p5657_p1 = scmp.eq.s32.totalorder %s4796_s9, 0  ;;  %p211_p3 = scmp.eq.s32.totalorder %s3388_s10, 1 }
  0x11   : > { %p3389_p5 = scmp.ge.s32.totalorder %s4714_s30, 1  ;;  %p244_p7 = scmp.lt.s32.totalorder %s4714_s30, 3 }
  0x12   : > { %p4805_p4 = por %p5657_p1, %p50_p0  ;;  %p4810_p6 = por %p211_p3, %p50_p0 }
  0x13   : > { %p4815_p8 = pnand %p3389_p5, %p244_p7  ;;  %s4716_s14 = smov [#allocation7]  }
  0x14   : > { %s5671_s11 = scalar_select %p4805_p4, 1, 0 }
  0x15   : > { %s5672_s12 = scalar_select %p4810_p6, 1, 0 }
  0x16   : > { %s5674_s13 = scalar_select %p4815_p8, 1, 0 }
  0x17   : > { %5673 = sst [smem:[#allocation21_spill]] %s5672_s12  ;;  %s256_s15 = sshll.u32 %s4716_s14, 4  ;;  %s4819_s15 = int_to_ptr.vmem [resolvable:$true] %s256_s15 }
  0x18   : > { %p3783_p9 = pneg %p4815_p8  ;;  %s4717_s17 = smov [#allocation8]  }
  0x19   : > { %s269_s18 = sshll.u32 %s4717_s17, 4  ;;  %s4718_s19 = smov [#allocation10]   ;;  %s4830_s18 = int_to_ptr.vmem [resolvable:$true] %s269_s18 }
  0x1a   : > { %p4826_p11 = pnand %p3783_p9, %p5657_p1  ;;  %s4832_s20 = sshll.u32 %s4718_s19, 4  ;;  %s283_s20 = int_to_ptr.vmem [resolvable:$true] %s4832_s20 }
  0x1b   : > { %s5676_s2 = sld [smem:[#allocation23_spill]] }
  0x1c   : > { %p4842_p13 = pneg %p4826_p11 }
  0x21   : > { %s4460_s23 = scalar_lea.hbm %s5676_s2, 8192 }
  0x22   : > { %p4461_p12 = scmp.ne.s32.totalorder %s5676_s2, %s4460_s23  ;;  %p4467_p5 = scmp.lt.u32.totalorder %s4460_s23, %s5676_s2 }
  0x24   : > { %p4463_p0 = pnand %p4842_p13, %p4461_p12 }
  0x26   : > { %p4464_p3 = pneg %p4463_p0 }
  0x28   : > { %p4469_p7 = pnand %p4467_p5, %p4464_p3 }
  0x2a   : > { %4472 = shalt.err (!%p4469_p7)
}
  0x2b   : > { %s4473_s17 = scalar_lea.vmem %s4819_s15, 8192  ;;  %p4481_p2 = scmp.lt.s32.totalorder %s4819_s15, %s4819_s15 }
  0x2c   : > { %p4474_p9 = scmp.ne.s32.totalorder %s4819_s15, %s4473_s17  ;;  %p4482_p6 = scmp.lt.s32.totalorder %s4473_s17, %s4473_s17 }
  0x2e   : > { %p4476_p10 = pnand %p4474_p9, %p4842_p13  ;;  %p4483_p12 = por %p4482_p6, %p4481_p2 }
  0x30   : > { %p4477_p1 = pneg %p4476_p10 }
  0x32   : > { %p4484_p0 = pnand %p4483_p12, %p4477_p1 }
  0x34   : > { %4487 = shalt.err (!%p4484_p0)
}
  0x35   : > { %s5662_s19 = smov 128   ;;  %s5663_s21 = smov 8  }
  0x36   : > { %3786 = dma.hbm_to_vmem [thread:$0]  (!%p4826_p11), %s5676_s2, 8192, %s4819_s15, [#allocation6], %s5662_s19, %s5662_s19, %s5663_s21  }
  0x37   : > { %s5678_s3 = sld [smem:[#allocation24_spill]] }
  0x3d   : > { %s4488_s10 = scalar_lea.hbm %s5678_s3, 4096 }
  0x3e   : > { %p4489_p1 = scmp.ne.s32.totalorder %s5678_s3, %s4488_s10  ;;  %p4495_p10 = scmp.lt.u32.totalorder %s4488_s10, %s5678_s3 }
  0x40   : > { %p4491_p2 = pnand %p4489_p1, %p4842_p13 }
  0x42   : > { %p4492_p6 = pneg %p4491_p2 }
  0x44   : > { %p4497_p3 = pnand %p4495_p10, %p4492_p6 }
  0x46   : > { %4500 = shalt.err (!%p4497_p3)
}
  0x47   : > { %s4501_s15 = scalar_lea.vmem %s4830_s18, 4096  ;;  %p4509_p12 = scmp.lt.s32.totalorder %s4830_s18, %s4830_s18 }
  0x48   : > { %p4502_p5 = scmp.ne.s32.totalorder %s4830_s18, %s4501_s15  ;;  %p4510_p0 = scmp.lt.s32.totalorder %s4501_s15, %s4501_s15 }
  0x4a   : > { %p4504_p7 = pnand %p4502_p5, %p4842_p13  ;;  %p4511_p1 = por %p4510_p0, %p4509_p12 }
  0x4c   : > { %p4505_p9 = pneg %p4504_p7 }
  0x4e   : > { %p4512_p2 = pnand %p4511_p1, %p4505_p9 }
  0x50   : > { %4515 = shalt.err (!%p4512_p2)
}
  0x51   : > { %3789 = dma.hbm_to_vmem [thread:$0]  (!%p4826_p11), %s5678_s3, 4096, %s4830_s18, [#allocation9], %s5662_s19, %s5662_s19, %s5663_s21  }
  0x52   : > { %s5679_s4 = sld [smem:[#allocation25_spill]] }
  0x58   : > { %s4516_s24 = scalar_lea.hbm %s5679_s4, 2048 }
  0x59   : > { %p4517_p6 = scmp.ne.s32.totalorder %s5679_s4, %s4516_s24  ;;  %p4523_p5 = scmp.lt.u32.totalorder %s4516_s24, %s5679_s4 }
  0x5b   : > { %p4519_p10 = pnand %p4517_p6, %p4842_p13 }
  0x5d   : > { %p4520_p3 = pneg %p4519_p10 }
  0x5f   : > { %p4525_p7 = pnand %p4523_p5, %p4520_p3 }
  0x61   : > { %4528 = shalt.err (!%p4525_p7)
}
  0x62   : > { %s4529_s15 = scalar_lea.vmem %s283_s20, 2048  ;;  %p4537_p1 = scmp.lt.s32.totalorder %s283_s20, %s283_s20 }
  0x63   : > { %p4530_p9 = scmp.ne.s32.totalorder %s283_s20, %s4529_s15  ;;  %p4538_p2 = scmp.lt.s32.totalorder %s4529_s15, %s4529_s15 }
  0x65   : > { %p4532_p12 = pnand %p4530_p9, %p4842_p13  ;;  %p4539_p4 = por %p4538_p2, %p4537_p1 }
  0x67   : > { %p4533_p0 = pneg %p4532_p12 }
  0x69   : > { %p4540_p8 = pnand %p4539_p4, %p4533_p0 }
  0x6b   : > { %4543 = shalt.err (!%p4540_p8)
}
  0x6c   : > { %3792 = dma.hbm_to_vmem [thread:$0]  (!%p4826_p11), %s5679_s4, 2048, %s283_s20, [#allocation9], %s5662_s19, %s5662_s19, %s5663_s21  }
  0x6d   : > { %s4721_s12 = smov [#allocation11]   ;;  %s4544_s25 = scalar_lea.hbm %s5653_s5, 8192 }
  0x6e   : > { %s295_s22 = sshll.u32 %s4721_s12, 4  ;;  %p4545_p4 = scmp.ne.s32.totalorder %s5653_s5, %s4544_s25  ;;  %s296_s22 = int_to_ptr.vmem [resolvable:$true] %s295_s22 }
  0x6f   : > { %p4551_p10 = scmp.lt.u32.totalorder %s4544_s25, %s5653_s5 }
  0x70   : > { %p4547_p8 = pnand %p4545_p4, %p4842_p13 }
  0x72   : > { %p4548_p6 = pneg %p4547_p8 }
  0x74   : > { %p4553_p3 = pnand %p4551_p10, %p4548_p6 }
  0x76   : > { %4556 = shalt.err (!%p4553_p3)
}
  0x77   : > { %s4557_s20 = scalar_lea.vmem %s296_s22, 8192  ;;  %p4565_p12 = scmp.lt.s32.totalorder %s296_s22, %s296_s22 }
  0x78   : > { %p4558_p5 = scmp.ne.s32.totalorder %s296_s22, %s4557_s20  ;;  %p4566_p0 = scmp.lt.s32.totalorder %s4557_s20, %s4557_s20 }
  0x7a   : > { %p4560_p7 = pnand %p4558_p5, %p4842_p13  ;;  %p4567_p1 = por %p4566_p0, %p4565_p12 }
  0x7c   : > { %p4561_p9 = pneg %p4560_p7 }
  0x7e   : > { %p4568_p2 = pnand %p4567_p1, %p4561_p9 }
  0x80   : > { %4571 = shalt.err (!%p4568_p2)
}
  0x81   : > { %s5664_s18 = smov 256   ;;  %s5665_s26 = smov 16  }
  0x82   : > { %3795 = dma.hbm_to_vmem [thread:$0]  (!%p4826_p11), %s5653_s5, 8192, %s296_s22, [#allocation12], %s5664_s18, %s5664_s18, %s5665_s26  }
  0x83   : > { %s4936_s23 = sadd.s32 1, %s4714_s30   ;;  %s37_s25 = sadd.s32 1, %s4710_s29 }
  0x84   : > { %s34_s24 = ssub.s32 %s4714_s30, %s4936_s23  ;;  %p44_p4 = scmp.ne.s32.totalorder %s4710_s29, %s4706_s28 }
  0x85   : > { %p35_p13 = scmp.eq.s32.totalorder %s34_s24, 0  ;;  %p45_p8 = scmp.eq.s32.totalorder %s4714_s30, 0 }
  0x86   : > { %p5680_p10 = scmp.eq.s32.totalorder %s4796_s9, 1  ;;  %p3811_p5 = scmp.lt.s32.totalorder %s4714_s30, 2 }
  0x87   : > { %s4945_s10 = scalar_select %p35_p13, %s4710_s29, %s37_s25  }
  0x88   : > { %p46_p6 = por %p45_p8, %p44_p4  ;;  %p4949_p3 = por %p5680_p10, %p44_p4 }
  0x89   : > { %s4955_s14 = sand.u32 1, %s4710_s29   ;;  %s3660_s17 = sshll.u32 %s4714_s30, 12 }
  0x8a   : > { %s3395_s22 = sshll.u32 %s4955_s14, 8  ;;  %s5682_s0 = sld [smem:[#allocation22_spill]] }
  0x8b   : > { %s316_s12 = scalar_lea.vmem [#allocation2], %s3395_s22  ;;  %p4966_p11 = pnand %p3811_p5, %p46_p6 }
  0x8c   : > { %s324_s24 = sshll.u32 %s316_s12, 4  ;;  %s3399_s21 = sshll.u32 %s4955_s14, 7  ;;  %s4964_s24 = int_to_ptr.vmem [resolvable:$true] %s324_s24 }
  0x8d   : > { %s313_s18 = scalar_lea.sflag [#allocation3], %s4955_s14  ;;  %p4574_p9 = pneg %p4966_p11 }
  0x90   : > { %s4962_s27 = scalar_lea.hbm %s5682_s0, %s3660_s17  ;;  %s4577_s20 = scalar_lea.hbm %s5682_s0, 8192 }
  0x91   : > { %s4572_s15 = scalar_lea.hbm %s4962_s27, 4096  ;;  %p4578_p1 = scmp.lt.u32.totalorder %s4962_s27, %s5682_s0 }
  0x92   : > { %p4573_p7 = scmp.ne.s32.totalorder %s4962_s27, %s4572_s15  ;;  %p4579_p2 = scmp.lt.u32.totalorder %s4577_s20, %s4572_s15 }
  0x93   : > { %p4581_p4 = scmp.lt.u32.totalorder %s4572_s15, %s4962_s27 }
  0x94   : > { %p4575_p12 = pnand %p4574_p9, %p4573_p7  ;;  %p4580_p13 = por %p4579_p2, %p4578_p1 }
  0x96   : > { %p4576_p0 = pneg %p4575_p12  ;;  %p4582_p8 = por %p4581_p4, %p4580_p13 }
  0x98   : > { %p4583_p6 = pnand %p4582_p8, %p4576_p0 }
  0x9a   : > { %4586 = shalt.err (!%p4583_p6)
}
  0x9b   : > { %s4587_s19 = scalar_lea.vmem %s4964_s24, 4096  ;;  %s4724_s22 = smov [#allocation2]  }
  0x9c   : > { %p4588_p10 = scmp.ne.s32.totalorder %s4964_s24, %s4587_s19  ;;  %s4592_s17 = sshll.u32 %s4724_s22, 4  ;;  %s4593_s17 = int_to_ptr.vmem [resolvable:$false] %s4592_s17 }
  0x9d   : > { %s4594_s26 = scalar_lea.vmem %s4593_s17, 8192  ;;  %p4595_p12 = scmp.lt.s32.totalorder %s4964_s24, %s4593_s17 }
  0x9e   : > { %p4590_p5 = pnand %p4588_p10, %p4574_p9  ;;  %p4596_p1 = scmp.lt.s32.totalorder %s4594_s26, %s4587_s19 }
  0xa0   : > { %p4591_p7 = pneg %p4590_p5  ;;  %p4597_p2 = por %p4596_p1, %p4595_p12 }
  0xa2   : > { %p4598_p13 = pnand %p4597_p2, %p4591_p7 }
  0xa4   : > { %4601 = shalt.err (!%p4598_p13)
}
  0xa5   : > { %s5684_s15 = smov 16   ;;  %s5685_s20 = smov 256  }
  0xa6   : > { %3799 = dma.hbm_to_vmem [thread:$0]  (!%p4966_p11), %s4962_s27, 4096, %s4964_s24, %s313_s18, %s5685_s20, %s5685_s20, %s5684_s15  }
  0xa7   : > { %s3661_s12 = sshll.u32 %s4714_s30, 11  ;;  %s338_s26 = scalar_lea.vmem [#allocation5], %s3399_s21 }
  0xa8   : > { %s5007_s17 = scalar_lea.hbm %s5649_s1, %s3661_s12  ;;  %s345_s0 = sshll.u32 %s338_s26, 4  ;;  %s5011_s0 = int_to_ptr.vmem [resolvable:$true] %s345_s0 }
  0xa9   : > { %s5686_s2 = sand.u32 1, %s4714_s30   ;;  %s4602_s4 = scalar_lea.hbm %s5007_s17, 2048 }
  0xaa   : > { %s5015_s3 = scalar_lea.sflag [#allocation6], %s5686_s2  ;;  %p4603_p0 = scmp.ne.s32.totalorder %s5007_s17, %s4602_s4 }
  0xab   : > { %s4607_s14 = scalar_lea.hbm %s5649_s1, 4096  ;;  %p4608_p6 = scmp.lt.u32.totalorder %s5007_s17, %s5649_s1 }
  0xac   : > { %p4605_p4 = pnand %p4603_p0, %p4574_p9  ;;  %p4609_p10 = scmp.lt.u32.totalorder %s4607_s14, %s4602_s4 }
  0xad   : > { %p4611_p7 = scmp.lt.u32.totalorder %s4602_s4, %s5007_s17 }
  0xae   : > { %p4606_p8 = pneg %p4605_p4  ;;  %p4610_p5 = por %p4609_p10, %p4608_p6 }
  0xb0   : > { %p4612_p12 = por %p4611_p7, %p4610_p5 }
  0xb2   : > { %p4613_p1 = pnand %p4612_p12, %p4606_p8 }
  0xb4   : > { %4616 = shalt.err (!%p4613_p1)
}
  0xb5   : > { %s4617_s2 = scalar_lea.vmem %s5011_s0, 2048  ;;  %s4725_s21 = smov [#allocation5]  }
  0xb6   : > { %p4618_p2 = scmp.ne.s32.totalorder %s5011_s0, %s4617_s2  ;;  %s4622_s20 = sshll.u32 %s4725_s21, 4  ;;  %s4623_s20 = int_to_ptr.vmem [resolvable:$false] %s4622_s20 }
  0xb7   : > { %s4624_s12 = scalar_lea.vmem %s4623_s20, 4096  ;;  %p4625_p4 = scmp.lt.s32.totalorder %s5011_s0, %s4623_s20 }
  0xb8   : > { %p4620_p13 = pnand %p4618_p2, %p4574_p9  ;;  %p4626_p6 = scmp.lt.s32.totalorder %s4624_s12, %s4617_s2 }
  0xba   : > { %p4621_p0 = pneg %p4620_p13  ;;  %p4627_p10 = por %p4626_p6, %p4625_p4 }
  0xbc   : > { %p4628_p5 = pnand %p4627_p10, %p4621_p0 }
  0xbe   : > { %4631 = shalt.err (!%p4628_p5)
}
  0xbf   : > { %s5687_s4 = smov 8   ;;  %s5688_s22 = smov 128  }
  0xc0   : > { %3802 = dma.hbm_to_vmem [thread:$0]  (!%p4966_p11), %s5007_s17, 2048, %s5011_s0, %s5015_s3, %s5688_s22, %s5688_s22, %s5687_s4  }
  0xc1   : > { %p5689_p9 = scmp.ne.s32.totalorder %s5674_s13, 0 }
  0xc2   : > { %s5047_s19 = sand.u32 (!%p5689_p9), 1, %s4706_s28   ;;  %p5690_p8 = scmp.ne.s32.totalorder (!%p5689_p9), %s5671_s11, 0 }
  0xc3   : > { %357 = sbr.rel (%p5689_p9) target bundleno = 1404 (0x57c), region = 48  ;;  %s3403_s26 = sshll.u32 (!%p5689_p9), %s5047_s19, 8 }
  0xc4   : > { %s360_s18 = scalar_lea.sflag (!%p5689_p9), [#allocation3], %s5047_s19  ;;  %s5053_s25 = scalar_lea.vmem (!%p5689_p9), [#allocation2], %s3403_s26 }
  0xca   : > { %4677 = dma.done.wait (%p5690_p8), %s360_s18, 4096  }
  0xcb   : > { %4679 = vsyncadd (%p5690_p8), %s360_s18, 4294963200  ;;  %s368_s0 = sand.u32 1, %s4796_s9   ;;  %s3404_s3 = sshll.u32 %s5047_s19, 7 }
  0xcc   : > { %s369_s13 = scalar_lea.sflag [#allocation6], %s368_s0  ;;  %s5061_s17 = scalar_lea.vmem [#allocation5], %s3404_s3 }
  0xcd   : > { %4681 = dma.done.wait (%p5690_p8), %s369_s13, 2048  }
  0xce   : > { %4683 = vsyncadd (%p5690_p8), %s369_s13, 4294965248  ;;  %p5691_p11 = scmp.eq.s32.totalorder %s4796_s9, 0 }
  0xd0   : > { %4685 = dma.done.wait (%p5691_p11), [#allocation6], 8192   ;;  %p5692_p7 = pmov %p5691_p11 }
  0xd2   : > { %4687 = vsyncadd (%p5692_p7), [#allocation6], 4294959104  ;;  %p5693_p12 = pmov %p5692_p7 }
  0xd3   : > { %p5694_p1 = pmov %p5692_p7 }
  0xd4   : > { %4689 = dma.done.wait (%p5693_p12), [#allocation9], 6144  }
  0xd5   : > { %4691 = vsyncadd (%p5694_p1), [#allocation9], 4294961152  ;;  %p5695_p2 = pmov %p5694_p1 }
  0xd6   : > { %p5696_p13 = pmov %p5694_p1 }
  0xd7   : > { %4693 = dma.done.wait (%p5695_p2), [#allocation12], 8192  }
  0xd8   : > { %4695 = vsyncadd (%p5696_p13), [#allocation12], 4294959104  ;;  %v3860_v0 = vld [vmem:[#allocation7 + $0x4] ss:$8 sps:$4 sm:$0xff]   ;;  %v3862_v1 = vld [vmem:[#allocation7] ss:$8 sps:$4 sm:$0xff]  }
  0xd9   : > { %1031 = vmatprep.subr.bf16.mxu0 %v3860_v0  ;;  %v3863_v2 = vld [vmem:[#allocation7 + $0x14] ss:$8 sps:$4 sm:$0xff]   ;;  %v3865_v3 = vld [vmem:[#allocation7 + $0x10] ss:$8 sps:$4 sm:$0xff]   ;;  %v3866_v4 = vld [vmem:[#allocation7 + $0x24] ss:$8 sps:$4 sm:$0xff]  }
  0xda   : > { %1032 = vmatpush1.bf16.msra.mxu0 %v3862_v1  ;;  %v3868_v5 = vld [vmem:[#allocation7 + $0x20] ss:$8 sps:$4 sm:$0xff]   ;;  %v3869_v6 = vld [vmem:[#allocation7 + $0x34] ss:$8 sps:$4 sm:$0xff]   ;;  %v3871_v7 = vld [vmem:[#allocation7 + $0x30] ss:$8 sps:$4 sm:$0xff]  }
  0xdb   : > { %1033 = vmatprep.subr.bf16.mxu0 %v3863_v2  ;;  %v3872_v8 = vld [vmem:[#allocation7 + $0x44] ss:$8 sps:$4 sm:$0xff]   ;;  %v3874_v9 = vld [vmem:[#allocation7 + $0x40] ss:$8 sps:$4 sm:$0xff]   ;;  %v3875_v10 = vld [vmem:[#allocation7 + $0x54] ss:$8 sps:$4 sm:$0xff]  }
  0xdc   : > { %v3877_v11 = vld [vmem:[#allocation7 + $0x50] ss:$8 sps:$4 sm:$0xff]   ;;  %v3878_v12 = vld [vmem:[#allocation7 + $0x64] ss:$8 sps:$4 sm:$0xff]   ;;  %v3880_v14 = vld [vmem:[#allocation7 + $0x60] ss:$8 sps:$4 sm:$0xff]  }
  0xdd   : > { %v3910_v13 = vld [vmem:[%s5053_s25 + $0x4] ss:$16 sps:$4 sm:$0xff]   ;;  %v3883_v16 = vld [vmem:[#allocation7 + $0x70] ss:$8 sps:$4 sm:$0xff]   ;;  %v3886_v18 = vld [vmem:[#allocation7 + $0x80] ss:$8 sps:$4 sm:$0xff]  }
  0xde   : > { %1034 = vmatpush1.bf16.msra.mxu0 %v3865_v3  ;;  %v3881_v15 = vld [vmem:[#allocation7 + $0x74] ss:$8 sps:$4 sm:$0xff]   ;;  %1063 = vmatprep.mubr.bf16.mxu0 %v3910_v13  ;;  %v3884_v17 = vld [vmem:[#allocation7 + $0x84] ss:$8 sps:$4 sm:$0xff]   ;;  %v3889_v20 = vld [vmem:[#allocation7 + $0x90] ss:$8 sps:$4 sm:$0xff]  }
  0xdf   : > { %1035 = vmatprep.subr.bf16.mxu0 %v3866_v4  ;;  %v3887_v19 = vld [vmem:[#allocation7 + $0x94] ss:$8 sps:$4 sm:$0xff]   ;;  %v3890_v21 = vld [vmem:[#allocation7 + $0xa4] ss:$8 sps:$4 sm:$0xff]   ;;  %v3892_v22 = vld [vmem:[#allocation7 + $0xa0] ss:$8 sps:$4 sm:$0xff]  }
  0xe0   : > { %v3893_v23 = vld [vmem:[#allocation7 + $0xb4] ss:$8 sps:$4 sm:$0xff]   ;;  %v3895_v24 = vld [vmem:[#allocation7 + $0xb0] ss:$8 sps:$4 sm:$0xff]   ;;  %v3896_v25 = vld [vmem:[#allocation7 + $0xc4] ss:$8 sps:$4 sm:$0xff]  }
  0xe1   : > { %v3898_v26 = vld [vmem:[#allocation7 + $0xc0] ss:$8 sps:$4 sm:$0xff]   ;;  %v3899_v27 = vld [vmem:[#allocation7 + $0xd4] ss:$8 sps:$4 sm:$0xff]   ;;  %v3901_v28 = vld [vmem:[#allocation7 + $0xd0] ss:$8 sps:$4 sm:$0xff]  }
  0xe2   : > { %1036 = vmatpush1.bf16.msra.mxu0 %v3868_v5  ;;  %v3902_v29 = vld [vmem:[#allocation7 + $0xe4] ss:$8 sps:$4 sm:$0xff]   ;;  %v3904_v30 = vld [vmem:[#allocation7 + $0xe0] ss:$8 sps:$4 sm:$0xff]   ;;  %v3905_v31 = vld [vmem:[#allocation7 + $0xf4] ss:$8 sps:$4 sm:$0xff]  }
  0xe3   : > { %1037 = vmatprep.subr.bf16.mxu0 %v3869_v6  ;;  %v3907_v32 = vld [vmem:[#allocation7 + $0xf0] ss:$8 sps:$4 sm:$0xff]   ;;  %v3913_v33 = vld [vmem:[#allocation7 + $0x104] ss:$8 sps:$4 sm:$0xff]   ;;  %v3911_v35 = vld [vmem:[#allocation7 + $0x100] ss:$8 sps:$4 sm:$0xff]  }
  0xe4   : > { %v3908_v34 = vld [vmem:[%s5053_s25] ss:$16 sps:$4 sm:$0xff]   ;;  %v3916_v36 = vld [vmem:[#allocation7 + $0x114] ss:$8 sps:$4 sm:$0xff]   ;;  %v4004_v38 = vld [vmem:[#allocation8 + $0x4] ss:$8 sps:$4 sm:$0xff]  }
  0xe5   : > { %v3917_v37 = vld [vmem:[%s5053_s25 + $0x24] ss:$16 sps:$4 sm:$0xff]   ;;  %v4006_v39 = vld [vmem:[#allocation8] ss:$8 sps:$4 sm:$0xff]   ;;  %1509 = vmatprep.subr.bf16.mxu1 %v4004_v38  ;;  %v3914_v41 = vld [vmem:[#allocation7 + $0x110] ss:$8 sps:$4 sm:$0xff]  }
  0xe6   : > { %1038 = vmatpush1.bf16.msra.mxu0 %v3871_v7  ;;  %v4007_v40 = vld [vmem:[#allocation8 + $0x14] ss:$8 sps:$4 sm:$0xff]   ;;  %v3922_v42 = vld [vmem:[#allocation7 + $0x124] ss:$8 sps:$4 sm:$0xff]   ;;  %1510 = vmatpush1.bf16.msra.mxu1 %v4006_v39  ;;  %v4009_v43 = vld [vmem:[#allocation8 + $0x10] ss:$8 sps:$4 sm:$0xff]  }
  0xe7   : > { %1039 = vmatprep.subr.bf16.mxu0 %v3872_v8  ;;  %1511 = vmatprep.subr.bf16.mxu1 %v4007_v40  ;;  %v4010_v44 = vld [vmem:[#allocation8 + $0x24] ss:$8 sps:$4 sm:$0xff]   ;;  %v3919_v45 = vld [vmem:[%s5053_s25 + $0x20] ss:$16 sps:$4 sm:$0xff]   ;;  %v3925_v47 = vld [vmem:[#allocation7 + $0x134] ss:$8 sps:$4 sm:$0xff]  }
  0xe8   : > { %v3920_v46 = vld [vmem:[#allocation7 + $0x120] ss:$8 sps:$4 sm:$0xff]   ;;  %v3926_v48 = vld [vmem:[%s5053_s25 + $0x44] ss:$16 sps:$4 sm:$0xff]   ;;  %v3923_v51 = vld [vmem:[#allocation7 + $0x130] ss:$8 sps:$4 sm:$0xff]  }
  0xe9   : > { %v4012_v49 = vld [vmem:[#allocation8 + $0x20] ss:$8 sps:$4 sm:$0xff]   ;;  %v4013_v50 = vld [vmem:[#allocation8 + $0x34] ss:$8 sps:$4 sm:$0xff]   ;;  %v3931_v52 = vld [vmem:[#allocation7 + $0x144] ss:$8 sps:$4 sm:$0xff]  }
  0xea   : > { %1040 = vmatpush1.bf16.msra.mxu0 %v3874_v9  ;;  %1512 = vmatpush1.bf16.msra.mxu1 %v4009_v43  ;;  %v4015_v53 = vld [vmem:[#allocation8 + $0x30] ss:$8 sps:$4 sm:$0xff]   ;;  %v4016_v54 = vld [vmem:[#allocation8 + $0x44] ss:$8 sps:$4 sm:$0xff]   ;;  %v3929_v56 = vld [vmem:[#allocation7 + $0x140] ss:$8 sps:$4 sm:$0xff]  }
  0xeb   : > { %1041 = vmatprep.subr.bf16.mxu0 %v3875_v10  ;;  %1513 = vmatprep.subr.bf16.mxu1 %v4010_v44  ;;  %v3928_v55 = vld [vmem:[%s5053_s25 + $0x40] ss:$16 sps:$4 sm:$0xff]   ;;  %v3934_v57 = vld [vmem:[#allocation7 + $0x154] ss:$8 sps:$4 sm:$0xff]   ;;  %v3940_v62 = vld [vmem:[#allocation7 + $0x164] ss:$8 sps:$4 sm:$0xff]  }
  0xec   : > { %v3935_v58 = vld [vmem:[%s5053_s25 + $0x64] ss:$16 sps:$4 sm:$0xff]   ;;  %v4018_v59 = vld [vmem:[#allocation8 + $0x40] ss:$8 sps:$4 sm:$0xff]   ;;  %v3932_v60 = vld [vmem:[#allocation7 + $0x150] ss:$8 sps:$4 sm:$0xff]  }
  0xed   : > { %v4019_v61 = vld [vmem:[#allocation8 + $0x54] ss:$8 sps:$4 sm:$0xff]   ;;  %v4021_v63 = vld [vmem:[#allocation8 + $0x50] ss:$8 sps:$4 sm:$0xff]   ;;  %v4022_v0 = vld [vmem:[#allocation8 + $0x64] ss:$8 sps:$4 sm:$0xff]  }
  0xee   : > { %1042 = vmatpush1.bf16.msra.mxu0 %v3877_v11  ;;  %1514 = vmatpush1.bf16.msra.mxu1 %v4012_v49  ;;  %v3937_v1 = vld [vmem:[%s5053_s25 + $0x60] ss:$16 sps:$4 sm:$0xff]   ;;  %v3944_v3 = vld [vmem:[%s5053_s25 + $0x84] ss:$16 sps:$4 sm:$0xff]   ;;  %v3980_v44 = vld [vmem:[%s5053_s25 + $0x8] ss:$16 sps:$4 sm:$0xff]  }
  0xef   : > { %1043 = vmatprep.subr.bf16.mxu0 %v3878_v12  ;;  %1515 = vmatprep.subr.bf16.mxu1 %v4013_v50  ;;  %v3938_v2 = vld [vmem:[#allocation7 + $0x160] ss:$8 sps:$4 sm:$0xff]   ;;  %v3943_v4 = vld [vmem:[#allocation7 + $0x174] ss:$8 sps:$4 sm:$0xff]   ;;  %v3941_v7 = vld [vmem:[#allocation7 + $0x170] ss:$8 sps:$4 sm:$0xff]  }
  0xf0   : > { %v4024_v5 = vld [vmem:[#allocation8 + $0x60] ss:$8 sps:$4 sm:$0xff]   ;;  %v4025_v6 = vld [vmem:[#allocation8 + $0x74] ss:$8 sps:$4 sm:$0xff]   ;;  %v3949_v8 = vld [vmem:[#allocation7 + $0x184] ss:$8 sps:$4 sm:$0xff]  }
  0xf1   : > { %v4027_v9 = vld [vmem:[#allocation8 + $0x70] ss:$8 sps:$4 sm:$0xff]   ;;  %v4028_v10 = vld [vmem:[#allocation8 + $0x84] ss:$8 sps:$4 sm:$0xff]   ;;  %v3947_v12 = vld [vmem:[#allocation7 + $0x180] ss:$8 sps:$4 sm:$0xff]  }
  0xf2   : > { %1044 = vmatpush1.bf16.msra.mxu0 %v3880_v14  ;;  %1516 = vmatpush1.bf16.msra.mxu1 %v4015_v53  ;;  %v3946_v11 = vld [vmem:[%s5053_s25 + $0x80] ss:$16 sps:$4 sm:$0xff]   ;;  %v3953_v13 = vld [vmem:[%s5053_s25 + $0xa4] ss:$16 sps:$4 sm:$0xff]   ;;  %v3989_v49 = vld [vmem:[%s5053_s25 + $0x6c] ss:$16 sps:$4 sm:$0xff]  }
  0xf3   : > { %1045 = vmatprep.subr.bf16.mxu0 %v3881_v15  ;;  %1517 = vmatprep.subr.bf16.mxu1 %v4016_v54  ;;  %v3952_v14 = vld [vmem:[#allocation7 + $0x194] ss:$8 sps:$4 sm:$0xff]   ;;  %v4030_v15 = vld [vmem:[#allocation8 + $0x80] ss:$8 sps:$4 sm:$0xff]   ;;  %v3976_v38 = vld [vmem:[#allocation7 + $0x1e4] ss:$8 sps:$4 sm:$0xff]  }
  0xf4   : > { %v3973_v39 = vld [vmem:[%s5053_s25 + $0xe0] ss:$16 sps:$4 sm:$0xff]   ;;  %v3991_v50 = vld [vmem:[%s5053_s25 + $0x68] ss:$16 sps:$4 sm:$0xff]   ;;  %v3995_v53 = vld [vmem:[%s5053_s25 + $0xac] ss:$16 sps:$4 sm:$0xff]  }
  0xf5   : > { %v3974_v40 = vld [vmem:[#allocation7 + $0x1e0] ss:$8 sps:$4 sm:$0xff]   ;;  %v3977_v43 = vld [vmem:[#allocation7 + $0x1f0] ss:$8 sps:$4 sm:$0xff]   ;;  %s3410_s14 = sshll.u32 %s4796_s9, 4  ;;  %s5423_s0 = scalar_lea.vmem [#allocation13], %s3403_s26 }
  0xf6   : > { %1046 = vmatpush1.bf16.msra.mxu0 %v3883_v16  ;;  %1518 = vmatpush1.bf16.msra.mxu1 %v4018_v59  ;;  %v4031_v16 = vld [vmem:[#allocation8 + $0x94] ss:$8 sps:$4 sm:$0xff]   ;;  %v3997_v54 = vld [vmem:[%s5053_s25 + $0xa8] ss:$16 sps:$4 sm:$0xff]   ;;  %p436_p0 = scmp.lt.s32.totalorder %s3410_s14, 31  ;;  %s3696_s26 = sshll.u32 %s4796_s9, 12 }
  0xf7   : > { %1047 = vmatprep.subr.bf16.mxu0 %v3884_v17  ;;  %1519 = vmatprep.subr.bf16.mxu1 %v4019_v61  ;;  %v3950_v17 = vld [vmem:[#allocation7 + $0x190] ss:$8 sps:$4 sm:$0xff]   ;;  %v4048_v61 = vld [vmem:[#allocation8 + $0xe0] ss:$8 sps:$4 sm:$0xff]   ;;  %s3224_s3 = sshll.u32 %s5423_s0, 4  ;;  %s5600_s11 = scalar_lea.hbm %s5655_s7, %s3696_s26  ;;  %s5602_s3 = int_to_ptr.vmem [resolvable:$true] %s3224_s3 }
  0xf8   : > { %v4045_v59 = vld [vmem:[#allocation8 + $0xd0] ss:$8 sps:$4 sm:$0xff]   ;;  %s5706_s14 = smov (!%p436_p0, %s3410_s14), 31  ;;  %s3204_s9 = scalar_lea.sflag [#allocation4], %s5047_s19 }
  0xf9   : > { %s3662_s2 = sshll.u32 %s5706_s14, 4  ;;  %s4632_s27 = scalar_lea.vmem %s5602_s3, 4096 }
  0xfa   : > { %1048 = vmatpush1.bf16.msra.mxu0 %v3886_v18  ;;  %1520 = vmatpush1.bf16.msra.mxu1 %v4021_v63  ;;  %v3958_v18 = vld [vmem:[#allocation7 + $0x1a4] ss:$8 sps:$4 sm:$0xff]   ;;  %v4051_v63 = vld [vmem:[#allocation8 + $0xf0] ss:$8 sps:$4 sm:$0xff]   ;;  %s5174_s12 = scalar_lea.vmem %s5656_s8, %s3662_s2  ;;  %p4633_p4 = scmp.ne.s32.totalorder %s5602_s3, %s4632_s27 }
  0xfb   : > { %1049 = vmatprep.subr.bf16.mxu0 %v3887_v19  ;;  %1521 = vmatprep.subr.bf16.mxu1 %v4022_v0  ;;  %v4033_v19 = vld [vmem:[#allocation8 + $0x90] ss:$8 sps:$4 sm:$0xff]   ;;  %v4054_v0 = vld [vmem:[#allocation10 + $0x4] ss:$8 sps:$4 sm:$0xff]   ;;  %s4727_s14 = smov [#allocation13]  }
  0xfc   : > { %p4634_p6 = pnand %p4633_p4, %p4949_p3  ;;  %s4636_s24 = sshll.u32 %s4727_s14, 4  ;;  %s4637_s24 = int_to_ptr.vmem [resolvable:$false] %s4636_s24 }
  0xfd   : > { %s4638_s15 = scalar_lea.vmem %s4637_s24, 8192  ;;  %p4639_p5 = scmp.lt.s32.totalorder %s5602_s3, %s4637_s24 }
  0xfe   : > { %1050 = vmatpush1.bf16.msra.mxu0 %v3889_v20  ;;  %1522 = vmatpush1.bf16.msra.mxu1 %v4024_v5  ;;  %v4034_v20 = vld [vmem:[#allocation8 + $0xa4] ss:$8 sps:$4 sm:$0xff]   ;;  %p4635_p10 = pneg %p4634_p6  ;;  %p4640_p9 = scmp.lt.s32.totalorder %s4638_s15, %s4632_s27 }
  0xff   : > { %1051 = vmatprep.subr.bf16.mxu0 %v3890_v21  ;;  %1523 = vmatprep.subr.bf16.mxu1 %v4025_v6  ;;  %v3955_v21 = vld [vmem:[%s5053_s25 + $0xa0] ss:$16 sps:$4 sm:$0xff]  }
 0x100   : > { %p4641_p8 = por %p4640_p9, %p4639_p5 }
 0x102   : > { %1052 = vmatpush1.bf16.msra.mxu0 %v3892_v22  ;;  %1524 = vmatpush1.bf16.msra.mxu1 %v4027_v9  ;;  %v3956_v22 = vld [vmem:[#allocation7 + $0x1a0] ss:$8 sps:$4 sm:$0xff]   ;;  %p4642_p11 = pnand %p4641_p8, %p4635_p10 }
 0x103   : > { %1053 = vmatprep.subr.bf16.mxu0 %v3893_v23  ;;  %1525 = vmatprep.subr.bf16.mxu1 %v4028_v10  ;;  %v3962_v23 = vld [vmem:[%s5053_s25 + $0xc4] ss:$16 sps:$4 sm:$0xff]  }
 0x106   : > { %1054 = vmatpush1.bf16.msra.mxu0 %v3895_v24  ;;  %1526 = vmatpush1.bf16.msra.mxu1 %v4030_v15  ;;  %v3961_v24 = vld [vmem:[#allocation7 + $0x1b4] ss:$8 sps:$4 sm:$0xff]  }
 0x107   : > { %1055 = vmatprep.subr.bf16.mxu0 %v3896_v25  ;;  %1527 = vmatprep.subr.bf16.mxu1 %v4031_v16  ;;  %v4036_v25 = vld [vmem:[#allocation8 + $0xa0] ss:$8 sps:$4 sm:$0xff]  }
 0x10a   : > { %1056 = vmatpush1.bf16.msra.mxu0 %v3898_v26  ;;  %v4037_v26 = vld [vmem:[#allocation8 + $0xb4] ss:$8 sps:$4 sm:$0xff]   ;;  %1528 = vmatpush1.bf16.msra.mxu1 %v4033_v19 }
 0x10b   : > { %1057 = vmatprep.subr.bf16.mxu0 %v3899_v27  ;;  %v3959_v27 = vld [vmem:[#allocation7 + $0x1b0] ss:$8 sps:$4 sm:$0xff]   ;;  %1529 = vmatprep.subr.bf16.mxu1 %v4034_v20 }
 0x10e   : > { %1058 = vmatpush1.bf16.msra.mxu0 %v3901_v28  ;;  %v3967_v28 = vld [vmem:[#allocation7 + $0x1c4] ss:$8 sps:$4 sm:$0xff]   ;;  %1530 = vmatpush1.bf16.msra.mxu1 %v4036_v25 }
 0x10f   : > { %1059 = vmatprep.subr.bf16.mxu0 %v3902_v29  ;;  %v4039_v29 = vld [vmem:[#allocation8 + $0xb0] ss:$8 sps:$4 sm:$0xff]   ;;  %1531 = vmatprep.subr.bf16.mxu1 %v4037_v26  ;;  %v4057_v26 = vld [vmem:[#allocation10 + $0x14] ss:$8 sps:$4 sm:$0xff]  }
 0x112   : > { %1060 = vmatpush1.bf16.msra.mxu0 %v3904_v30  ;;  %v4040_v30 = vld [vmem:[#allocation8 + $0xc4] ss:$8 sps:$4 sm:$0xff]   ;;  %1532 = vmatpush1.bf16.msra.mxu1 %v4039_v29 }
 0x113   : > { %1061 = vmatprep.subr.bf16.mxu0 %v3905_v31  ;;  %v3964_v31 = vld [vmem:[%s5053_s25 + $0xc0] ss:$16 sps:$4 sm:$0xff]   ;;  %1533 = vmatprep.subr.bf16.mxu1 %v4040_v30 }
 0x116   : > { %1062 = vmatpush1.bf16.msra.mxu0 %v3907_v32  ;;  %v3965_v32 = vld [vmem:[#allocation7 + $0x1c0] ss:$8 sps:$4 sm:$0xff]  }
 0x117   : > { %1144 = vmatprep.subr.bf16.mxu0 %v3913_v33  ;;  %v3971_v33 = vld [vmem:[%s5053_s25 + $0xe4] ss:$16 sps:$4 sm:$0xff]  }
 0x119   : > { %1064 = vmatmul.mubr.bf16.vlgmr.msra.gmra.mrb[0].mxu0 %v3908_v34  ;;  %v3970_v34 = vld [vmem:[#allocation7 + $0x1d4] ss:$8 sps:$4 sm:$0xff]  }
 0x11a   : > { %1145 = vmatpush1.bf16.msra.mxu0 %v3911_v35  ;;  %1073 = vmatprep.mubr.bf16.mxu0 %v3917_v37  ;;  %v4042_v35 = vld [vmem:[#allocation8 + $0xc0] ss:$8 sps:$4 sm:$0xff]   ;;  %v3968_v37 = vld [vmem:[#allocation7 + $0x1d0] ss:$8 sps:$4 sm:$0xff]  }
 0x11b   : > { %1146 = vmatprep.subr.bf16.mxu0 %v3916_v36  ;;  %v4043_v36 = vld [vmem:[#allocation8 + $0xd4] ss:$8 sps:$4 sm:$0xff]   ;;  %1534 = vmatpush1.bf16.msra.mxu1 %v4042_v35  ;;  %v4060_v35 = vld [vmem:[#allocation10 + $0x24] ss:$8 sps:$4 sm:$0xff]  }
 0x11c   : > { %1535 = vmatprep.subr.bf16.mxu1 %v4043_v36 }
 0x11e   : > { %1147 = vmatpush1.bf16.msra.mxu0 %v3914_v41  ;;  %v3982_v41 = vld [vmem:[%s5053_s25 + $0xc] ss:$16 sps:$4 sm:$0xff]  }
 0x11f   : > { %1148 = vmatprep.subr.bf16.mxu0 %v3922_v42  ;;  %v3979_v42 = vld [vmem:[#allocation7 + $0x1f4] ss:$8 sps:$4 sm:$0xff]   ;;  %1536 = vmatpush1.bf16.msra.mxu1 %v4045_v59  ;;  %v4064_v59 = vld [vmem:[#allocation10 + $0x40] ss:$8 sps:$4 sm:$0xff]  }
 0x121   : > { %1074 = vmatmul.mubr.bf16.gmra.mrb[4].mxu0 %v3919_v45  ;;  %v3983_v45 = vld [vmem:[%s5053_s25 + $0x2c] ss:$16 sps:$4 sm:$0xff]  }
 0x122   : > { %1149 = vmatpush1.bf16.msra.mxu0 %v3920_v46  ;;  %1083 = vmatprep.mubr.bf16.mxu0 %v3926_v48  ;;  %v3985_v46 = vld [vmem:[%s5053_s25 + $0x28] ss:$16 sps:$4 sm:$0xff]  }
 0x123   : > { %1150 = vmatprep.subr.bf16.mxu0 %v3925_v47  ;;  %v3986_v47 = vld [vmem:[%s5053_s25 + $0x4c] ss:$16 sps:$4 sm:$0xff]   ;;  %v3988_v48 = vld [vmem:[%s5053_s25 + $0x48] ss:$16 sps:$4 sm:$0xff]  }
 0x126   : > { %1151 = vmatpush1.bf16.msra.mxu0 %v3923_v51  ;;  %v3992_v51 = vld [vmem:[%s5053_s25 + $0x8c] ss:$16 sps:$4 sm:$0xff]  }
 0x127   : > { %1152 = vmatprep.subr.bf16.mxu0 %v3931_v52  ;;  %v3994_v52 = vld [vmem:[%s5053_s25 + $0x88] ss:$16 sps:$4 sm:$0xff]  }
 0x129   : > { %1084 = vmatmul.mubr.bf16.gmra.mrb[8].mxu0 %v3928_v55  ;;  %v3998_v55 = vld [vmem:[%s5053_s25 + $0xcc] ss:$16 sps:$4 sm:$0xff]  }
 0x12a   : > { %1153 = vmatpush1.bf16.msra.mxu0 %v3929_v56  ;;  %1093 = vmatprep.mubr.bf16.mxu0 %v3935_v58  ;;  %v4000_v56 = vld [vmem:[%s5053_s25 + $0xc8] ss:$16 sps:$4 sm:$0xff]  }
 0x12b   : > { %1154 = vmatprep.subr.bf16.mxu0 %v3934_v57  ;;  %v4001_v57 = vld [vmem:[%s5053_s25 + $0xec] ss:$16 sps:$4 sm:$0xff]   ;;  %v4003_v58 = vld [vmem:[%s5053_s25 + $0xe8] ss:$16 sps:$4 sm:$0xff]  }
 0x12e   : > { %1155 = vmatpush1.bf16.msra.mxu0 %v3932_v60  ;;  %v4046_v60 = vld [vmem:[#allocation8 + $0xe4] ss:$8 sps:$4 sm:$0xff]  }
 0x12f   : > { %1156 = vmatprep.subr.bf16.mxu0 %v3940_v62  ;;  %1537 = vmatprep.subr.bf16.mxu1 %v4046_v60  ;;  %v4049_v62 = vld [vmem:[#allocation8 + $0xf4] ss:$8 sps:$4 sm:$0xff]  }
 0x130   : > { %1538 = vmatpush1.bf16.msra.mxu1 %v4048_v61 }
 0x131   : > { %1094 = vmatmul.mubr.bf16.gmra.mrb[12].mxu0 %v3937_v1  ;;  %1539 = vmatprep.subr.bf16.mxu1 %v4049_v62  ;;  %v541_v1 = vlaneseq }
 0x132   : > { %1157 = vmatpush1.bf16.msra.mxu0 %v3938_v2  ;;  %1103 = vmatprep.mubr.bf16.mxu0 %v3944_v3 }
 0x133   : > { %1158 = vmatprep.subr.bf16.mxu0 %v3943_v4  ;;  %v5111_v2 = vshrl.u32 %v541_v1, 7  ;;  %v539_v4 = vld [vmem:[%s5654_s6] sm:$0x3] }
 0x134   : > { %1540 = vmatpush1.bf16.msra.mxu1 %v4051_v63 }
 0x135   : > { %1866 = vmatprep.subr.bf16.mxu1 %v4054_v0  ;;  %v5114_v3 = vsub.s32 0, %v5111_v2  ;;  %v5120_v5 = vsub.s32 1, %v5111_v2 }
 0x136   : > { %1159 = vmatpush1.bf16.msra.mxu0 %v3941_v7 }
 0x137   : > { %1160 = vmatprep.subr.bf16.mxu0 %v3949_v8  ;;  %v5123_v6 = vrot.slane %v539_v4, %v5114_v3  ;;  %v5126_v7 = vrot.slane %v539_v4, %v5120_v5 }
 0x139   : > { %1104 = vmatmul.mubr.bf16.gmra.mrb[16].mxu0 %v3946_v11 }
 0x13a   : > { %1161 = vmatpush1.bf16.msra.mxu0 %v3947_v12  ;;  %1113 = vmatprep.mubr.bf16.mxu0 %v3953_v13 }
 0x13b   : > { %1162 = vmatprep.subr.bf16.mxu0 %v3952_v14 }
 0x13e   : > { %1163 = vmatpush1.bf16.msra.mxu0 %v3950_v17 }
 0x13f   : > { %1164 = vmatprep.subr.bf16.mxu0 %v3958_v18 }
 0x141   : > { %1114 = vmatmul.mubr.bf16.gmra.mrb[20].mxu0 %v3955_v21 }
 0x142   : > { %1165 = vmatpush1.bf16.msra.mxu0 %v3956_v22  ;;  %1123 = vmatprep.mubr.bf16.mxu0 %v3962_v23  ;;  %v4052_v23 = vld [vmem:[#allocation10] ss:$8 sps:$4 sm:$0xff]  }
 0x143   : > { %1166 = vmatprep.subr.bf16.mxu0 %v3961_v24 }
 0x146   : > { %1167 = vmatpush1.bf16.msra.mxu0 %v3959_v27 }
 0x147   : > { %1168 = vmatprep.subr.bf16.mxu0 %v3967_v28 }
 0x149   : > { %1124 = vmatmul.mubr.bf16.gmra.mrb[24].mxu0 %v3964_v31 }
 0x14a   : > { %1169 = vmatpush1.bf16.msra.mxu0 %v3965_v32  ;;  %1133 = vmatprep.mubr.bf16.mxu0 %v3971_v33  ;;  %v4055_v32 = vld [vmem:[#allocation10 + $0x10] ss:$8 sps:$4 sm:$0xff]  }
 0x14b   : > { %1170 = vmatprep.subr.bf16.mxu0 %v3970_v34 }
 0x14e   : > { %1171 = vmatpush1.bf16.msra.mxu0 %v3968_v37 }
 0x14f   : > { %1172 = vmatprep.subr.bf16.mxu0 %v3976_v38 }
 0x151   : > { %1134 = vmatmul.mubr.bf16.gmra.mrb[28].mxu0 %v3973_v39 }
 0x152   : > { %1173 = vmatpush1.bf16.msra.mxu0 %v3974_v40  ;;  %1176 = vmatprep.mubr.bf16.mxu0 %v3982_v41  ;;  %v4058_v41 = vld [vmem:[#allocation10 + $0x20] ss:$8 sps:$4 sm:$0xff]  }
 0x153   : > { %1174 = vmatprep.subr.bf16.mxu0 %v3979_v42 }
 0x156   : > { %1175 = vmatpush1.bf16.msra.mxu0 %v3977_v43 }
 0x159   : > { %1177 = vmatmul.mubr.bf16.vlgmr.msra.gmra.mrb[0].mxu0 %v3980_v44  ;;  %v4063_v44 = vld [vmem:[#allocation10 + $0x34] ss:$8 sps:$4 sm:$0xff]  }
 0x15a   : > { %1186 = vmatprep.mubr.bf16.mxu0 %v3983_v45 }
 0x161   : > { %1187 = vmatmul.mubr.bf16.gmra.mrb[4].mxu0 %v3985_v46 }
 0x162   : > { %1196 = vmatprep.mubr.bf16.mxu0 %v3986_v47 }
 0x169   : > { %1197 = vmatmul.mubr.bf16.gmra.mrb[8].mxu0 %v3988_v48 }
 0x16a   : > { %1206 = vmatprep.mubr.bf16.mxu0 %v3989_v49 }
 0x171   : > { %1207 = vmatmul.mubr.bf16.gmra.mrb[12].mxu0 %v3991_v50  ;;  %v4061_v50 = vld [vmem:[#allocation10 + $0x30] ss:$8 sps:$4 sm:$0xff]  }
 0x172   : > { %1216 = vmatprep.mubr.bf16.mxu0 %v3992_v51 }
 0x179   : > { %1217 = vmatmul.mubr.bf16.gmra.mrb[16].mxu0 %v3994_v52 }
 0x17a   : > { %1226 = vmatprep.mubr.bf16.mxu0 %v3995_v53  ;;  %v4066_v53 = vld [vmem:[#allocation10 + $0x44] ss:$8 sps:$4 sm:$0xff]  }
 0x181   : > { %1227 = vmatmul.mubr.bf16.gmra.mrb[20].mxu0 %v3997_v54 }
 0x182   : > { %1236 = vmatprep.mubr.bf16.mxu0 %v3998_v55 }
 0x189   : > { %1237 = vmatmul.mubr.bf16.gmra.mrb[24].mxu0 %v4000_v56 }
 0x18a   : > { %1246 = vmatprep.mubr.bf16.mxu0 %v4001_v57 }
 0x191   : > { %1247 = vmatmul.mubr.bf16.gmra.mrb[28].mxu0 %v4003_v58 }
 0x22c   : > { %v1178_v8 = vpop.f32.mrb[0].mxu0 }
 0x22d   : > { %v3697_v9 = vadd.f32 %v1178_v8, %v5123_v6  ;;  %v1180_v10 = vpop.f32.mrb[1].mxu0 }
 0x22e   : > { %v3698_v11 = vadd.f32 %v1180_v10, %v5126_v7  ;;  %v1182_v12 = vpop.f32.mrb[2].mxu0 }
 0x22f   : > { %v3699_v13 = vadd.f32 %v1182_v12, %v5123_v6  ;;  %v1184_v14 = vpop.f32.mrb[3].mxu0  ;;  %v1257_v16 = vmax.f32 %v3697_v9, 0.0 }
 0x230   : > { %v3700_v15 = vadd.f32 %v1184_v14, %v5126_v7  ;;  %v1258_v18 = vmax.f32 %v3698_v11, 0.0 }
 0x231   : > { %v1259_v17 = vmax.f32 %v3699_v13, 0.0 }
 0x232   : > { %v1260_v19 = vmax.f32 %v3700_v15, 0.0 }
 0x233   : > { %v1289_v20 = vpack.c.bf16 %v1259_v17, %v1257_v16 }
 0x234   : > { %v1188_v21 = vpop.f32.mrb[4].mxu0  ;;  %v1290_v22 = vpack.c.bf16 %v1260_v19, %v1258_v18 }
 0x235   : > { %v3701_v24 = vadd.f32 %v1188_v21, %v5123_v6  ;;  %v1190_v25 = vpop.f32.mrb[5].mxu0 }
 0x236   : > { %v3702_v27 = vadd.f32 %v1190_v25, %v5126_v7  ;;  %v1192_v28 = vpop.f32.mrb[6].mxu0  ;;  %1541 = vmatprep.mubr.bf16.mxu1 %v1290_v22 }
 0x237   : > { %v3703_v29 = vadd.f32 %v1192_v28, %v5123_v6  ;;  %v1194_v30 = vpop.f32.mrb[7].mxu0  ;;  %1542 = vmatmul.mubr.bf16.vlgmr.msra.gmra.mrb[0].mxu1 %v1289_v20  ;;  %v1261_v33 = vmax.f32 %v3701_v24, 0.0 }
 0x238   : > { %v3704_v31 = vadd.f32 %v1194_v30, %v5126_v7  ;;  %1867 = vmatpush1.bf16.msra.mxu1 %v4052_v23  ;;  %v1262_v36 = vmax.f32 %v3702_v27, 0.0 }
 0x239   : > { %v1263_v34 = vmax.f32 %v3703_v29, 0.0  ;;  %1868 = vmatprep.subr.bf16.mxu1 %v4057_v26 }
 0x23a   : > { %v1264_v37 = vmax.f32 %v3704_v31, 0.0 }
 0x23b   : > { %v1291_v38 = vpack.c.bf16 %v1263_v34, %v1261_v33 }
 0x23c   : > { %v1292_v39 = vpack.c.bf16 %v1264_v37, %v1262_v36  ;;  %v1198_v40 = vpop.f32.mrb[8].mxu0  ;;  %1869 = vmatpush1.bf16.msra.mxu1 %v4055_v32 }
 0x23d   : > { %v3705_v42 = vadd.f32 %v1198_v40, %v5123_v6  ;;  %v1200_v43 = vpop.f32.mrb[9].mxu0  ;;  %1870 = vmatprep.subr.bf16.mxu1 %v4060_v35 }
 0x23e   : > { %v3706_v45 = vadd.f32 %v1200_v43, %v5126_v7  ;;  %v1202_v46 = vpop.f32.mrb[10].mxu0  ;;  %1551 = vmatprep.mubr.bf16.mxu1 %v1292_v39 }
 0x23f   : > { %v3707_v47 = vadd.f32 %v1202_v46, %v5123_v6  ;;  %v1204_v48 = vpop.f32.mrb[11].mxu0  ;;  %1552 = vmatmul.mubr.bf16.gmra.mrb[4].mxu1 %v1291_v38  ;;  %v1265_v51 = vmax.f32 %v3705_v42, 0.0 }
 0x240   : > { %v3708_v49 = vadd.f32 %v1204_v48, %v5126_v7  ;;  %1871 = vmatpush1.bf16.msra.mxu1 %v4058_v41  ;;  %v1266_v54 = vmax.f32 %v3706_v45, 0.0 }
 0x241   : > { %v1267_v52 = vmax.f32 %v3707_v47, 0.0  ;;  %1872 = vmatprep.subr.bf16.mxu1 %v4063_v44 }
 0x242   : > { %v1268_v55 = vmax.f32 %v3708_v49, 0.0 }
 0x243   : > { %v1293_v56 = vpack.c.bf16 %v1267_v52, %v1265_v51 }
 0x244   : > { %v1294_v57 = vpack.c.bf16 %v1268_v55, %v1266_v54  ;;  %v1208_v58 = vpop.f32.mrb[12].mxu0  ;;  %1873 = vmatpush1.bf16.msra.mxu1 %v4061_v50 }
 0x245   : > { %v3709_v60 = vadd.f32 %v1208_v58, %v5123_v6  ;;  %v1210_v61 = vpop.f32.mrb[13].mxu0  ;;  %1874 = vmatprep.subr.bf16.mxu1 %v4066_v53 }
 0x246   : > { %v3710_v62 = vadd.f32 %v1210_v61, %v5126_v7  ;;  %v1212_v63 = vpop.f32.mrb[14].mxu0  ;;  %1561 = vmatprep.mubr.bf16.mxu1 %v1294_v57 }
 0x247   : > { %v3711_v0 = vadd.f32 %v1212_v63, %v5123_v6  ;;  %v1214_v1 = vpop.f32.mrb[15].mxu0  ;;  %1562 = vmatmul.mubr.bf16.gmra.mrb[8].mxu1 %v1293_v56  ;;  %v1269_v8 = vmax.f32 %v3709_v60, 0.0 }
 0x248   : > { %v3712_v4 = vadd.f32 %v1214_v1, %v5126_v7  ;;  %1875 = vmatpush1.bf16.msra.mxu1 %v4064_v59  ;;  %v1270_v10 = vmax.f32 %v3710_v62, 0.0 }
 0x249   : > { %v1271_v9 = vmax.f32 %v3711_v0, 0.0 }
 0x24a   : > { %v1272_v11 = vmax.f32 %v3712_v4, 0.0 }
 0x24b   : > { %v1295_v12 = vpack.c.bf16 %v1271_v9, %v1269_v8 }
 0x24c   : > { %v1296_v13 = vpack.c.bf16 %v1272_v11, %v1270_v10  ;;  %v1218_v14 = vpop.f32.mrb[16].mxu0  ;;  %v4069_v11 = vld [vmem:[#allocation10 + $0x54] ss:$8 sps:$4 sm:$0xff]  }
 0x24d   : > { %v3713_v15 = vadd.f32 %v1218_v14, %v5123_v6  ;;  %v1220_v16 = vpop.f32.mrb[17].mxu0  ;;  %1876 = vmatprep.subr.bf16.mxu1 %v4069_v11  ;;  %v4070_v14 = vld [vmem:[#allocation10 + $0x60] ss:$8 sps:$4 sm:$0xff]  }
 0x24e   : > { %v3714_v17 = vadd.f32 %v1220_v16, %v5126_v7  ;;  %v1222_v18 = vpop.f32.mrb[18].mxu0  ;;  %1571 = vmatprep.mubr.bf16.mxu1 %v1296_v13  ;;  %v4072_v13 = vld [vmem:[#allocation10 + $0x64] ss:$8 sps:$4 sm:$0xff]   ;;  %v4076_v16 = vld [vmem:[#allocation11] ss:$16 sps:$4 sm:$0xff]  }
 0x24f   : > { %v3715_v19 = vadd.f32 %v1222_v18, %v5123_v6  ;;  %v1224_v20 = vpop.f32.mrb[19].mxu0  ;;  %1572 = vmatmul.mubr.bf16.gmra.mrb[12].mxu1 %v1295_v12  ;;  %v1273_v22 = vmax.f32 %v3713_v15, 0.0  ;;  %v4067_v12 = vld [vmem:[#allocation10 + $0x50] ss:$8 sps:$4 sm:$0xff]   ;;  %v4081_v18 = vld [vmem:[#allocation11 + $0xc] ss:$16 sps:$4 sm:$0xff]  }
 0x250   : > { %v3716_v21 = vadd.f32 %v1224_v20, %v5126_v7  ;;  %v1274_v24 = vmax.f32 %v3714_v17, 0.0  ;;  %1877 = vmatpush1.bf16.msra.mxu1 %v4067_v12  ;;  %v4073_v15 = vld [vmem:[#allocation10 + $0x70] ss:$8 sps:$4 sm:$0xff]   ;;  %v4078_v17 = vld [vmem:[#allocation11 + $0x4] ss:$16 sps:$4 sm:$0xff]  }
 0x251   : > { %v1275_v23 = vmax.f32 %v3715_v19, 0.0  ;;  %1878 = vmatprep.subr.bf16.mxu1 %v4072_v13  ;;  %v4084_v19 = vld [vmem:[#allocation11 + $0x24] ss:$16 sps:$4 sm:$0xff]   ;;  %2433 = vmatprep.subr.bf16.mxu0 %v4078_v17  ;;  %v4082_v20 = vld [vmem:[#allocation11 + $0x20] ss:$16 sps:$4 sm:$0xff]   ;;  %v1655_v17 = vld [vmem:[%s5061_s17 + $0x8] sm:$0xff] }
 0x252   : > { %v1276_v25 = vmax.f32 %v3716_v21, 0.0  ;;  %2434 = vmatpush1.bf16.msra.mxu0 %v4076_v16  ;;  %v4090_v21 = vld [vmem:[#allocation11 + $0x44] ss:$16 sps:$4 sm:$0xff]  }
 0x253   : > { %v1297_v26 = vpack.c.bf16 %v1275_v23, %v1273_v22  ;;  %2435 = vmatprep.subr.bf16.mxu0 %v4084_v19  ;;  %v4088_v22 = vld [vmem:[#allocation11 + $0x40] ss:$16 sps:$4 sm:$0xff]   ;;  %v4096_v23 = vld [vmem:[#allocation11 + $0x64] ss:$16 sps:$4 sm:$0xff]  }
 0x254   : > { %v1298_v27 = vpack.c.bf16 %v1276_v25, %v1274_v24  ;;  %v1228_v28 = vpop.f32.mrb[20].mxu0  ;;  %1879 = vmatpush1.bf16.msra.mxu1 %v4070_v14  ;;  %v4094_v24 = vld [vmem:[#allocation11 + $0x60] ss:$16 sps:$4 sm:$0xff]   ;;  %v4102_v25 = vld [vmem:[#allocation11 + $0x84] ss:$16 sps:$4 sm:$0xff]  }
 0x255   : > { %v3717_v29 = vadd.f32 %v1228_v28, %v5123_v6  ;;  %v1230_v30 = vpop.f32.mrb[21].mxu0  ;;  %v4106_v28 = vld [vmem:[#allocation11 + $0xa0] ss:$16 sps:$4 sm:$0xff]  }
 0x256   : > { %v3718_v31 = vadd.f32 %v1230_v30, %v5126_v7  ;;  %v1232_v32 = vpop.f32.mrb[22].mxu0  ;;  %1581 = vmatprep.mubr.bf16.mxu1 %v1298_v27  ;;  %2436 = vmatpush1.bf16.msra.mxu0 %v4082_v20  ;;  %v4108_v27 = vld [vmem:[#allocation11 + $0xa4] ss:$16 sps:$4 sm:$0xff]   ;;  %v4112_v30 = vld [vmem:[#allocation11 + $0xc0] ss:$16 sps:$4 sm:$0xff]  }
 0x257   : > { %v3719_v33 = vadd.f32 %v1232_v32, %v5123_v6  ;;  %v1234_v34 = vpop.f32.mrb[23].mxu0  ;;  %1582 = vmatmul.mubr.bf16.gmra.mrb[16].mxu1 %v1297_v26  ;;  %v1277_v36 = vmax.f32 %v3717_v29, 0.0  ;;  %2437 = vmatprep.subr.bf16.mxu0 %v4090_v21  ;;  %v4100_v26 = vld [vmem:[#allocation11 + $0x80] ss:$16 sps:$4 sm:$0xff]   ;;  %v4114_v29 = vld [vmem:[#allocation11 + $0xc4] ss:$16 sps:$4 sm:$0xff]  }
 0x258   : > { %v3720_v35 = vadd.f32 %v1234_v34, %v5126_v7  ;;  %v1278_v38 = vmax.f32 %v3718_v31, 0.0  ;;  %v4120_v31 = vld [vmem:[#allocation11 + $0xe4] ss:$16 sps:$4 sm:$0xff]   ;;  %v4118_v32 = vld [vmem:[#allocation11 + $0xe0] ss:$16 sps:$4 sm:$0xff]  }
 0x259   : > { %v1279_v37 = vmax.f32 %v3719_v33, 0.0  ;;  %v4126_v33 = vld [vmem:[#allocation11 + $0x104] ss:$16 sps:$4 sm:$0xff]   ;;  %v4124_v34 = vld [vmem:[#allocation11 + $0x100] ss:$16 sps:$4 sm:$0xff]  }
 0x25a   : > { %v1280_v39 = vmax.f32 %v3720_v35, 0.0  ;;  %2438 = vmatpush1.bf16.msra.mxu0 %v4088_v22  ;;  %v4132_v35 = vld [vmem:[#allocation11 + $0x124] ss:$16 sps:$4 sm:$0xff]  }
 0x25b   : > { %v1299_v40 = vpack.c.bf16 %v1279_v37, %v1277_v36  ;;  %2439 = vmatprep.subr.bf16.mxu0 %v4096_v23  ;;  %v4130_v36 = vld [vmem:[#allocation11 + $0x120] ss:$16 sps:$4 sm:$0xff]   ;;  %v4138_v37 = vld [vmem:[#allocation11 + $0x144] ss:$16 sps:$4 sm:$0xff]  }
 0x25c   : > { %v1300_v41 = vpack.c.bf16 %v1280_v39, %v1278_v38  ;;  %v1238_v42 = vpop.f32.mrb[24].mxu0  ;;  %v1337_v38 = vld [vmem:[%s5654_s6 + $0x2] sm:$0x3] }
 0x25d   : > { %v3721_v43 = vadd.f32 %v1238_v42, %v5123_v6  ;;  %v1240_v44 = vpop.f32.mrb[25].mxu0  ;;  %v4136_v39 = vld [vmem:[#allocation11 + $0x140] ss:$16 sps:$4 sm:$0xff]   ;;  %v5169_v42 = vrot.slane %v1337_v38, %v5120_v5 }
 0x25e   : > { %v3722_v45 = vadd.f32 %v1240_v44, %v5126_v7  ;;  %v1242_v46 = vpop.f32.mrb[26].mxu0  ;;  %1591 = vmatprep.mubr.bf16.mxu1 %v1300_v41  ;;  %2440 = vmatpush1.bf16.msra.mxu0 %v4094_v24  ;;  %v5166_v41 = vrot.slane %v1337_v38, %v5114_v3  ;;  %v4150_v44 = vld [vmem:[#allocation11 + $0x184] ss:$16 sps:$4 sm:$0xff]   ;;  %v4087_v38 = vld [vmem:[#allocation11 + $0x2c] ss:$16 sps:$4 sm:$0xff]  }
 0x25f   : > { %v3723_v47 = vadd.f32 %v1242_v46, %v5123_v6  ;;  %v1244_v48 = vpop.f32.mrb[27].mxu0  ;;  %1592 = vmatmul.mubr.bf16.gmra.mrb[20].mxu1 %v1299_v40  ;;  %v1281_v50 = vmax.f32 %v3721_v43, 0.0  ;;  %2441 = vmatprep.subr.bf16.mxu0 %v4102_v25  ;;  %v4144_v40 = vld [vmem:[#allocation11 + $0x164] ss:$16 sps:$4 sm:$0xff]   ;;  %v4142_v43 = vld [vmem:[#allocation11 + $0x160] ss:$16 sps:$4 sm:$0xff]  }
 0x260   : > { %v3724_v49 = vadd.f32 %v1244_v48, %v5126_v7  ;;  %v1282_v52 = vmax.f32 %v3722_v45, 0.0  ;;  %v1654_v12 = vld [vmem:[%s5061_s17] sm:$0xff] }
 0x261   : > { %v1283_v51 = vmax.f32 %v3723_v47, 0.0 }
 0x262   : > { %v1284_v53 = vmax.f32 %v3724_v49, 0.0  ;;  %2442 = vmatpush1.bf16.msra.mxu0 %v4100_v26 }
 0x263   : > { %v1301_v54 = vpack.c.bf16 %v1283_v51, %v1281_v50  ;;  %2443 = vmatprep.subr.bf16.mxu0 %v4108_v27  ;;  %v4148_v50 = vld [vmem:[#allocation11 + $0x180] ss:$16 sps:$4 sm:$0xff]  }
 0x264   : > { %v1302_v55 = vpack.c.bf16 %v1284_v53, %v1282_v52  ;;  %v1248_v56 = vpop.f32.mrb[28].mxu0  ;;  %v4156_v53 = vld [vmem:[#allocation11 + $0x1a4] ss:$16 sps:$4 sm:$0xff]  }
 0x265   : > { %v3725_v57 = vadd.f32 %v1248_v56, %v5123_v6  ;;  %v1250_v58 = vpop.f32.mrb[29].mxu0 }
 0x266   : > { %v3726_v59 = vadd.f32 %v1250_v58, %v5126_v7  ;;  %v1252_v60 = vpop.f32.mrb[30].mxu0  ;;  %1601 = vmatprep.mubr.bf16.mxu1 %v1302_v55  ;;  %2444 = vmatpush1.bf16.msra.mxu0 %v4106_v28  ;;  %v4154_v58 = vld [vmem:[#allocation11 + $0x1a0] ss:$16 sps:$4 sm:$0xff]  }
 0x267   : > { %v3727_v61 = vadd.f32 %v1252_v60, %v5123_v6  ;;  %v1254_v62 = vpop.f32.mrb[31].mxu0  ;;  %1602 = vmatmul.mubr.bf16.gmra.mrb[24].mxu1 %v1301_v54  ;;  %v1285_v0 = vmax.f32 %v3725_v57, 0.0  ;;  %v4075_v6 = vld [vmem:[#allocation10 + $0x74] ss:$8 sps:$4 sm:$0xff]   ;;  %2445 = vmatprep.subr.bf16.mxu0 %v4114_v29 }
 0x268   : > { %v3728_v63 = vadd.f32 %v1254_v62, %v5126_v7  ;;  %v1286_v4 = vmax.f32 %v3726_v59, 0.0  ;;  %1880 = vmatprep.subr.bf16.mxu1 %v4075_v6  ;;  %v4726_v7 = vmov 0  }
 0x269   : > { %v1287_v1 = vmax.f32 %v3727_v61, 0.0  ;;  %1881 = vmatpush1.bf16.msra.mxu1 %v4073_v15 }
 0x26a   : > { %v1288_v8 = vmax.f32 %v3728_v63, 0.0  ;;  %2546 = vmatprep.subr.bf16.mxu1 %v4081_v18  ;;  %2446 = vmatpush1.bf16.msra.mxu0 %v4112_v30 }
 0x26b   : > { %v1303_v9 = vpack.c.bf16 %v1287_v1, %v1285_v0  ;;  %2447 = vmatprep.subr.bf16.mxu0 %v4120_v31 }
 0x26c   : > { %v1304_v10 = vpack.c.bf16 %v1288_v8, %v1286_v4 }
 0x26e   : > { %1611 = vmatprep.mubr.bf16.mxu1 %v1304_v10  ;;  %2448 = vmatpush1.bf16.msra.mxu0 %v4118_v32 }
 0x26f   : > { %1612 = vmatmul.mubr.bf16.gmra.mrb[28].mxu1 %v1303_v9  ;;  %2449 = vmatprep.subr.bf16.mxu0 %v4126_v33  ;;  %v1656_v33 = vld [vmem:[%s5061_s17 + $0x10] sm:$0xff] }
 0x270   : > { %1898 = vmatprep.mubr.bf16.mxu1 %v4726_v7 }
 0x272   : > { %2450 = vmatpush1.bf16.msra.mxu0 %v4124_v34  ;;  %v4079_v34 = vld [vmem:[#allocation11 + $0x8] ss:$16 sps:$4 sm:$0xff]  }
 0x273   : > { %2451 = vmatprep.subr.bf16.mxu0 %v4132_v35 }
 0x276   : > { %2452 = vmatpush1.bf16.msra.mxu0 %v4130_v36 }
 0x277   : > { %2453 = vmatprep.subr.bf16.mxu0 %v4138_v37 }
 0x27a   : > { %2454 = vmatpush1.bf16.msra.mxu0 %v4136_v39 }
 0x27b   : > { %2455 = vmatprep.subr.bf16.mxu0 %v4144_v40 }
 0x27e   : > { %2456 = vmatpush1.bf16.msra.mxu0 %v4142_v43 }
 0x27f   : > { %2457 = vmatprep.subr.bf16.mxu0 %v4150_v44  ;;  %v1657_v44 = vld [vmem:[%s5061_s17 + $0x18] sm:$0xff] }
 0x282   : > { %2458 = vmatpush1.bf16.msra.mxu0 %v4148_v50 }
 0x283   : > { %2459 = vmatprep.subr.bf16.mxu0 %v4156_v53 }
 0x286   : > { %2460 = vmatpush1.bf16.msra.mxu0 %v4154_v58 }
 0x30a   : > { %v1543_v45 = vpop.f32.mrb[0].mxu1 }
 0x30b   : > { %v1544_v46 = vadd.f32 %v1543_v45, %v5166_v41  ;;  %v1545_v47 = vpop.f32.mrb[1].mxu1 }
 0x30c   : > { %v1546_v48 = vadd.f32 %v1545_v47, %v5169_v42  ;;  %v1547_v49 = vpop.f32.mrb[2].mxu1 }
 0x30d   : > { %1622 = vst [vmem:[%s5174_s12] sm:$0xff] %v1544_v46  ;;  %v1548_v51 = vadd.f32 %v1547_v49, %v5166_v41  ;;  %v1549_v52 = vpop.f32.mrb[3].mxu1 }
 0x30e   : > { %1623 = vst [vmem:[%s5174_s12 + $0x8] sm:$0xff] %v1546_v48  ;;  %v1670_v54 = vmul.f32 0.5, %v1546_v48  ;;  %v1550_v55 = vadd.f32 %v1549_v52, %v5169_v42 }
 0x30f   : > { %1624 = vst [vmem:[%s5174_s12 + $0x10] sm:$0xff] %v1548_v51 }
 0x310   : > { %v1686_v56 = vmul.f32 1.442695, %v1670_v54  ;;  %1625 = vst [vmem:[%s5174_s12 + $0x18] sm:$0xff] %v1550_v55  ;;  %v1671_v57 = vmul.f32 0.5, %v1550_v55  ;;  %v4093_v54 = vld [vmem:[#allocation11 + $0x4c] ss:$16 sps:$4 sm:$0xff]  }
 0x312   : > { %4172 = vpow2.f32 %v1686_v56  ;;  %v1688_v59 = vmul.f32 1.442695, %v1671_v57  ;;  %v1553_v60 = vpop.f32.mrb[4].mxu1 }
 0x313   : > { %v5185_v61 = vadd.f32 %v1553_v60, %v5166_v41  ;;  %v1555_v62 = vpop.f32.mrb[5].mxu1  ;;  %v1658_v60 = vld [vmem:[%s5061_s17 + $0x20] sm:$0xff] }
 0x314   : > { %4174 = vpow2.f32 %v1688_v59  ;;  %v1556_v63 = vadd.f32 %v1555_v62, %v5169_v42  ;;  %v1557_v0 = vpop.f32.mrb[6].mxu1  ;;  %v4091_v62 = vld [vmem:[#allocation11 + $0x48] ss:$16 sps:$4 sm:$0xff]  }
 0x315   : > { %1626 = vst [vmem:[%s5174_s12 + $0x20] sm:$0xff] %v5185_v61  ;;  %v5191_v1 = vadd.f32 %v1557_v0, %v5166_v41  ;;  %v1559_v4 = vpop.f32.mrb[7].mxu1 }
 0x316   : > { %1627 = vst [vmem:[%s5174_s12 + $0x28] sm:$0xff] %v1556_v63  ;;  %v1672_v8 = vmul.f32 0.5, %v1556_v63  ;;  %v1560_v9 = vadd.f32 %v1559_v4, %v5169_v42  ;;  %v4099_v4 = vld [vmem:[#allocation11 + $0x6c] ss:$16 sps:$4 sm:$0xff]  }
 0x317   : > { %1628 = vst [vmem:[%s5174_s12 + $0x30] sm:$0xff] %v5191_v1 }
 0x318   : > { %v1690_v10 = vmul.f32 1.442695, %v1672_v8  ;;  %1629 = vst [vmem:[%s5174_s12 + $0x38] sm:$0xff] %v1560_v9  ;;  %v1673_v11 = vmul.f32 0.5, %v1560_v9 }
 0x31a   : > { %4176 = vpow2.f32 %v1690_v10  ;;  %v1692_v13 = vmul.f32 1.442695, %v1673_v11  ;;  %v1563_v14 = vpop.f32.mrb[8].mxu1  ;;  %v1659_v10 = vld [vmem:[%s5061_s17 + $0x28] sm:$0xff] }
 0x31b   : > { %v5200_v6 = vadd.f32 %v1563_v14, %v5166_v41  ;;  %v1565_v15 = vpop.f32.mrb[9].mxu1 }
 0x31c   : > { %v4173_v16 = vpop.eup %4172  ;;  %4178 = vpow2.f32 %v1692_v13  ;;  %v1566_v18 = vadd.f32 %v1565_v15, %v5169_v42  ;;  %v1567_v19 = vpop.f32.mrb[10].mxu1 }
 0x31d   : > { %v1718_v20 = vmul.f32 %v4173_v16, %v1654_v12  ;;  %1630 = vst [vmem:[%s5174_s12 + $0x40] sm:$0xff] %v5200_v6  ;;  %v5207_v21 = vadd.f32 %v1567_v19, %v5166_v41  ;;  %v1569_v22 = vpop.f32.mrb[11].mxu1 }
 0x31e   : > { %v4175_v23 = vpop.eup %4174  ;;  %1631 = vst [vmem:[%s5174_s12 + $0x48] sm:$0xff] %v1566_v18  ;;  %v1674_v24 = vmul.f32 0.5, %v1566_v18  ;;  %v1570_v25 = vadd.f32 %v1569_v22, %v5169_v42 }
 0x31f   : > { %v1719_v26 = vmul.f32 %v4175_v23, %v1655_v17  ;;  %1632 = vst [vmem:[%s5174_s12 + $0x50] sm:$0xff] %v5207_v21  ;;  %v1734_v27 = vadd.f32 %v1718_v20, %v1544_v46  ;;  %v4097_v17 = vld [vmem:[#allocation11 + $0x68] ss:$16 sps:$4 sm:$0xff]   ;;  %v4105_v20 = vld [vmem:[#allocation11 + $0x8c] ss:$16 sps:$4 sm:$0xff]  }
 0x320   : > { %v1694_v28 = vmul.f32 1.442695, %v1674_v24  ;;  %1633 = vst [vmem:[%s5174_s12 + $0x58] sm:$0xff] %v1570_v25  ;;  %v1675_v29 = vmul.f32 0.5, %v1570_v25 }
 0x321   : > { %v1735_v30 = vadd.f32 %v1719_v26, %v1548_v51  ;;  %v4085_v51 = vld [vmem:[#allocation11 + $0x28] ss:$16 sps:$4 sm:$0xff]  }
 0x322   : > { %4180 = vpow2.f32 %v1694_v28  ;;  %v1696_v31 = vmul.f32 1.442695, %v1675_v29  ;;  %v1573_v32 = vpop.f32.mrb[12].mxu1  ;;  %v4103_v28 = vld [vmem:[#allocation11 + $0x88] ss:$16 sps:$4 sm:$0xff]  }
 0x323   : > { %v5216_v35 = vadd.f32 %v1573_v32, %v5166_v41  ;;  %v1575_v36 = vpop.f32.mrb[13].mxu1  ;;  %v1750_v37 = vpack.c.bf16 %v1735_v30, %v1734_v27  ;;  %v1660_v27 = vld [vmem:[%s5061_s17 + $0x30] sm:$0xff] }
 0x324   : > { %v4177_v39 = vpop.eup %4176  ;;  %4182 = vpow2.f32 %v1696_v31  ;;  %v1576_v40 = vadd.f32 %v1575_v36, %v5169_v42  ;;  %v1577_v43 = vpop.f32.mrb[14].mxu1  ;;  %v4111_v31 = vld [vmem:[#allocation11 + $0xac] ss:$16 sps:$4 sm:$0xff]  }
 0x325   : > { %1634 = vst [vmem:[%s5174_s12 + $0x60] sm:$0xff] %v5216_v35  ;;  %v5223_v45 = vadd.f32 %v1577_v43, %v5166_v41  ;;  %v1579_v46 = vpop.f32.mrb[15].mxu1  ;;  %1899 = vmatmul.mubr.bf16.vlgmr.msra.gmra.mrb[32].mxu1 %v1750_v37  ;;  %v1720_v47 = vmul.f32 %v4177_v39, %v1656_v33 }
 0x326   : > { %v4179_v48 = vpop.eup %4178  ;;  %1635 = vst [vmem:[%s5174_s12 + $0x68] sm:$0xff] %v1576_v40  ;;  %v1676_v49 = vmul.f32 0.5, %v1576_v40  ;;  %v1580_v50 = vadd.f32 %v1579_v46, %v5169_v42  ;;  %1908 = vmatprep.mubr.bf16.mxu1 %v4726_v7  ;;  %2547 = vmatpush1.bf16.msra.mxu1 %v4079_v34  ;;  %v1661_v34 = vld [vmem:[%s5061_s17 + $0x38] sm:$0xff] }
 0x327   : > { %1636 = vst [vmem:[%s5174_s12 + $0x70] sm:$0xff] %v5223_v45  ;;  %v1721_v52 = vmul.f32 %v4179_v48, %v1657_v44  ;;  %v1736_v53 = vadd.f32 %v1720_v47, %v5185_v61  ;;  %2548 = vmatprep.subr.bf16.mxu1 %v4087_v38  ;;  %v4109_v44 = vld [vmem:[#allocation11 + $0xa8] ss:$16 sps:$4 sm:$0xff]   ;;  %v4117_v48 = vld [vmem:[#allocation11 + $0xcc] ss:$16 sps:$4 sm:$0xff]  }
 0x328   : > { %v1698_v55 = vmul.f32 1.442695, %v1676_v49  ;;  %1637 = vst [vmem:[%s5174_s12 + $0x78] sm:$0xff] %v1580_v50  ;;  %v1677_v56 = vmul.f32 0.5, %v1580_v50 }
 0x329   : > { %v1737_v57 = vadd.f32 %v1721_v52, %v5191_v1 }
 0x32a   : > { %4184 = vpow2.f32 %v1698_v55  ;;  %v1700_v58 = vmul.f32 1.442695, %v1677_v56  ;;  %v1583_v59 = vpop.f32.mrb[16].mxu1  ;;  %2549 = vmatpush1.bf16.msra.mxu1 %v4085_v51  ;;  %v4115_v55 = vld [vmem:[#allocation11 + $0xc8] ss:$16 sps:$4 sm:$0xff]  }
 0x32b   : > { %v5235_v63 = vadd.f32 %v1583_v59, %v5166_v41  ;;  %v1585_v61 = vpop.f32.mrb[17].mxu1  ;;  %v1751_v0 = vpack.c.bf16 %v1737_v57, %v1736_v53  ;;  %2550 = vmatprep.subr.bf16.mxu1 %v4093_v54  ;;  %v1662_v54 = vld [vmem:[%s5061_s17 + $0x40] sm:$0xff] }
 0x32c   : > { %v4181_v8 = vpop.eup %4180  ;;  %4186 = vpow2.f32 %v1700_v58  ;;  %v1586_v1 = vadd.f32 %v1585_v61, %v5169_v42  ;;  %v1587_v9 = vpop.f32.mrb[18].mxu1  ;;  %v4123_v58 = vld [vmem:[#allocation11 + $0xec] ss:$16 sps:$4 sm:$0xff]  }
 0x32d   : > { %1638 = vst [vmem:[%s5174_s12 + $0x80] sm:$0xff] %v5235_v63  ;;  %v5242_v11 = vadd.f32 %v1587_v9, %v5166_v41  ;;  %v1589_v12 = vpop.f32.mrb[19].mxu1  ;;  %1909 = vmatmul.mubr.bf16.gmra.mrb[36].mxu1 %v1751_v0  ;;  %v1722_v13 = vmul.f32 %v4181_v8, %v1658_v60 }
 0x32e   : > { %v4183_v14 = vpop.eup %4182  ;;  %1639 = vst [vmem:[%s5174_s12 + $0x88] sm:$0xff] %v1586_v1  ;;  %v1678_v15 = vmul.f32 0.5, %v1586_v1  ;;  %v1590_v16 = vadd.f32 %v1589_v12, %v5169_v42  ;;  %1918 = vmatprep.mubr.bf16.mxu1 %v4726_v7  ;;  %2551 = vmatpush1.bf16.msra.mxu1 %v4091_v62  ;;  %v1663_v62 = vld [vmem:[%s5061_s17 + $0x48] sm:$0xff] }
 0x32f   : > { %1640 = vst [vmem:[%s5174_s12 + $0x90] sm:$0xff] %v5242_v11  ;;  %v1723_v18 = vmul.f32 %v4183_v14, %v1659_v10  ;;  %v1738_v19 = vadd.f32 %v1722_v13, %v5200_v6  ;;  %2552 = vmatprep.subr.bf16.mxu1 %v4099_v4  ;;  %v4121_v10 = vld [vmem:[#allocation11 + $0xe8] ss:$16 sps:$4 sm:$0xff]   ;;  %v4129_v14 = vld [vmem:[#allocation11 + $0x10c] ss:$16 sps:$4 sm:$0xff]  }
 0x330   : > { %v1702_v22 = vmul.f32 1.442695, %v1678_v15  ;;  %1641 = vst [vmem:[%s5174_s12 + $0x98] sm:$0xff] %v1590_v16  ;;  %v1679_v23 = vmul.f32 0.5, %v1590_v16 }
 0x331   : > { %v1739_v24 = vadd.f32 %v1723_v18, %v5207_v21 }
 0x332   : > { %4188 = vpow2.f32 %v1702_v22  ;;  %v1704_v25 = vmul.f32 1.442695, %v1679_v23  ;;  %v1593_v26 = vpop.f32.mrb[20].mxu1  ;;  %2553 = vmatpush1.bf16.msra.mxu1 %v4097_v17  ;;  %v4127_v22 = vld [vmem:[#allocation11 + $0x108] ss:$16 sps:$4 sm:$0xff]  }
 0x333   : > { %v5254_v29 = vadd.f32 %v1593_v26, %v5166_v41  ;;  %v1595_v6 = vpop.f32.mrb[21].mxu1  ;;  %v1752_v30 = vpack.c.bf16 %v1739_v24, %v1738_v19  ;;  %2554 = vmatprep.subr.bf16.mxu1 %v4105_v20  ;;  %v1664_v20 = vld [vmem:[%s5061_s17 + $0x50] sm:$0xff] }
 0x334   : > { %v4185_v32 = vpop.eup %4184  ;;  %4190 = vpow2.f32 %v1704_v25  ;;  %v1596_v21 = vadd.f32 %v1595_v6, %v5169_v42  ;;  %v1597_v33 = vpop.f32.mrb[22].mxu1  ;;  %v4135_v25 = vld [vmem:[#allocation11 + $0x12c] ss:$16 sps:$4 sm:$0xff]  }
 0x335   : > { %1642 = vst [vmem:[%s5174_s12 + $0xa0] sm:$0xff] %v5254_v29  ;;  %v5261_v36 = vadd.f32 %v1597_v33, %v5166_v41  ;;  %v1599_v37 = vpop.f32.mrb[23].mxu1  ;;  %1919 = vmatmul.mubr.bf16.gmra.mrb[40].mxu1 %v1752_v30  ;;  %v1724_v38 = vmul.f32 %v4185_v32, %v1660_v27 }
 0x336   : > { %v4187_v39 = vpop.eup %4186  ;;  %1643 = vst [vmem:[%s5174_s12 + $0xa8] sm:$0xff] %v1596_v21  ;;  %v1680_v40 = vmul.f32 0.5, %v1596_v21  ;;  %v1600_v43 = vadd.f32 %v1599_v37, %v5169_v42  ;;  %1928 = vmatprep.mubr.bf16.mxu1 %v4726_v7  ;;  %2555 = vmatpush1.bf16.msra.mxu1 %v4103_v28  ;;  %v1665_v28 = vld [vmem:[%s5061_s17 + $0x58] sm:$0xff] }
 0x337   : > { %1644 = vst [vmem:[%s5174_s12 + $0xb0] sm:$0xff] %v5261_v36  ;;  %v1725_v46 = vmul.f32 %v4187_v39, %v1661_v34  ;;  %v1740_v47 = vadd.f32 %v1724_v38, %v5216_v35  ;;  %2556 = vmatprep.subr.bf16.mxu1 %v4111_v31  ;;  %v4133_v34 = vld [vmem:[#allocation11 + $0x128] ss:$16 sps:$4 sm:$0xff]  }
 0x338   : > { %v1706_v49 = vmul.f32 1.442695, %v1680_v40  ;;  %1645 = vst [vmem:[%s5174_s12 + $0xb8] sm:$0xff] %v1600_v43  ;;  %v1681_v50 = vmul.f32 0.5, %v1600_v43 }
 0x339   : > { %v1741_v51 = vadd.f32 %v1725_v46, %v5223_v45  ;;  %v1666_v46 = vld [vmem:[%s5061_s17 + $0x60] sm:$0xff] }
 0x33a   : > { %4192 = vpow2.f32 %v1706_v49  ;;  %v1708_v52 = vmul.f32 1.442695, %v1681_v50  ;;  %v1603_v53 = vpop.f32.mrb[24].mxu1  ;;  %2557 = vmatpush1.bf16.msra.mxu1 %v4109_v44 }
 0x33b   : > { %v5273_v56 = vadd.f32 %v1603_v53, %v5166_v41  ;;  %v1605_v35 = vpop.f32.mrb[25].mxu1  ;;  %v1753_v57 = vpack.c.bf16 %v1741_v51, %v1740_v47  ;;  %2558 = vmatprep.subr.bf16.mxu1 %v4117_v48  ;;  %v4147_v48 = vld [vmem:[#allocation11 + $0x16c] ss:$16 sps:$4 sm:$0xff]  }
 0x33c   : > { %v4189_v59 = vpop.eup %4188  ;;  %4194 = vpow2.f32 %v1708_v52  ;;  %v1606_v45 = vadd.f32 %v1605_v35, %v5169_v42  ;;  %v1607_v60 = vpop.f32.mrb[26].mxu1  ;;  %v1668_v35 = vld [vmem:[%s5061_s17 + $0x70] sm:$0xff] }
 0x33d   : > { %1646 = vst [vmem:[%s5174_s12 + $0xc0] sm:$0xff] %v5273_v56  ;;  %v5280_v61 = vadd.f32 %v1607_v60, %v5166_v41  ;;  %v1609_v0 = vpop.f32.mrb[27].mxu1  ;;  %1929 = vmatmul.mubr.bf16.gmra.mrb[44].mxu1 %v1753_v57  ;;  %v1726_v4 = vmul.f32 %v4189_v59, %v1662_v54  ;;  %v4153_v54 = vld [vmem:[#allocation11 + $0x18c] ss:$16 sps:$4 sm:$0xff]   ;;  %v4151_v57 = vld [vmem:[#allocation11 + $0x188] ss:$16 sps:$4 sm:$0xff]  }
 0x33e   : > { %v4191_v8 = vpop.eup %4190  ;;  %1647 = vst [vmem:[%s5174_s12 + $0xc8] sm:$0xff] %v1606_v45  ;;  %v1682_v1 = vmul.f32 0.5, %v1606_v45  ;;  %v1610_v9 = vadd.f32 %v1609_v0, %v5169_v42  ;;  %1938 = vmatprep.mubr.bf16.mxu1 %v4726_v7  ;;  %2559 = vmatpush1.bf16.msra.mxu1 %v4115_v55  ;;  %v4159_v59 = vld [vmem:[#allocation11 + $0x1ac] ss:$16 sps:$4 sm:$0xff]  }
 0x33f   : > { %1648 = vst [vmem:[%s5174_s12 + $0xd0] sm:$0xff] %v5280_v61  ;;  %v1727_v12 = vmul.f32 %v4191_v8, %v1663_v62  ;;  %v1742_v13 = vadd.f32 %v1726_v4, %v5235_v63  ;;  %2560 = vmatprep.subr.bf16.mxu1 %v4123_v58  ;;  %v1669_v60 = vld [vmem:[%s5061_s17 + $0x78] sm:$0xff] }
 0x340   : > { %v1710_v15 = vmul.f32 1.442695, %v1682_v1  ;;  %1649 = vst [vmem:[%s5174_s12 + $0xd8] sm:$0xff] %v1610_v9  ;;  %v1683_v16 = vmul.f32 0.5, %v1610_v9  ;;  %v4157_v4 = vld [vmem:[#allocation11 + $0x1a8] ss:$16 sps:$4 sm:$0xff]  }
 0x341   : > { %v1743_v17 = vadd.f32 %v1727_v12, %v5242_v11  ;;  %v4162_v9 = vld [vmem:[#allocation11 + $0x1c4] ss:$16 sps:$4 sm:$0xff]   ;;  %v4160_v12 = vld [vmem:[#allocation11 + $0x1c0] ss:$16 sps:$4 sm:$0xff]  }
 0x342   : > { %4196 = vpow2.f32 %v1710_v15  ;;  %v1712_v18 = vmul.f32 1.442695, %v1683_v16  ;;  %v1613_v19 = vpop.f32.mrb[28].mxu1  ;;  %2561 = vmatpush1.bf16.msra.mxu1 %v4121_v10  ;;  %v4165_v10 = vld [vmem:[#allocation11 + $0x1cc] ss:$16 sps:$4 sm:$0xff]   ;;  %2461 = vmatprep.subr.bf16.mxu0 %v4162_v9 }
 0x343   : > { %v5292_v23 = vadd.f32 %v1613_v19, %v5166_v41  ;;  %v1615_v63 = vpop.f32.mrb[29].mxu1  ;;  %v1754_v24 = vpack.c.bf16 %v1743_v17, %v1742_v13  ;;  %2562 = vmatprep.subr.bf16.mxu1 %v4129_v14  ;;  %v4163_v13 = vld [vmem:[#allocation11 + $0x1c8] ss:$16 sps:$4 sm:$0xff]   ;;  %2462 = vmatpush1.bf16.msra.mxu0 %v4160_v12  ;;  %v4168_v14 = vld [vmem:[#allocation11 + $0x1e4] ss:$16 sps:$4 sm:$0xff]  }
 0x344   : > { %v4193_v26 = vpop.eup %4192  ;;  %4198 = vpow2.f32 %v1712_v18  ;;  %v1616_v11 = vadd.f32 %v1615_v63, %v5169_v42  ;;  %v1617_v27 = vpop.f32.mrb[30].mxu1  ;;  %v4166_v15 = vld [vmem:[#allocation11 + $0x1e0] ss:$16 sps:$4 sm:$0xff]   ;;  %v4169_v16 = vld [vmem:[#allocation11 + $0x1e8] ss:$16 sps:$4 sm:$0xff]   ;;  %2463 = vmatprep.subr.bf16.mxu0 %v4168_v14 }
 0x345   : > { %1650 = vst [vmem:[%s5174_s12 + $0xe0] sm:$0xff] %v5292_v23  ;;  %v1618_v6 = vadd.f32 %v1617_v27, %v5166_v41  ;;  %v1619_v30 = vpop.f32.mrb[31].mxu1  ;;  %1939 = vmatmul.mubr.bf16.gmra.mrb[48].mxu1 %v1754_v24  ;;  %v1728_v31 = vmul.f32 %v4193_v26, %v1664_v20  ;;  %v4141_v41 = vld [vmem:[#allocation11 + $0x14c] ss:$16 sps:$4 sm:$0xff]   ;;  %v1774_v17 = vld [vmem:[%s5654_s6 + $0x4] sm:$0x3] }
 0x346   : > { %v4195_v32 = vpop.eup %4194  ;;  %1651 = vst [vmem:[%s5174_s12 + $0xe8] sm:$0xff] %v1616_v11  ;;  %v1684_v21 = vmul.f32 0.5, %v1616_v11  ;;  %v1620_v33 = vadd.f32 %v1619_v30, %v5169_v42  ;;  %1948 = vmatprep.mubr.bf16.mxu1 %v4726_v7  ;;  %2563 = vmatpush1.bf16.msra.mxu1 %v4127_v22  ;;  %v4139_v42 = vld [vmem:[#allocation11 + $0x148] ss:$16 sps:$4 sm:$0xff]   ;;  %v5319_v18 = vrot.slane %v1774_v17, %v5114_v3 }
 0x347   : > { %1652 = vst [vmem:[%s5174_s12 + $0xf0] sm:$0xff] %v1618_v6  ;;  %v1729_v37 = vmul.f32 %v4195_v32, %v1665_v28  ;;  %v1744_v38 = vadd.f32 %v1728_v31, %v5254_v29  ;;  %2564 = vmatprep.subr.bf16.mxu1 %v4135_v25  ;;  %v1667_v29 = vld [vmem:[%s5061_s17 + $0x68] sm:$0xff]  ;;  %2464 = vmatpush1.bf16.msra.mxu0 %v4166_v15 }
 0x348   : > { %v1714_v39 = vmul.f32 1.442695, %v1684_v21  ;;  %1653 = vst [vmem:[%s5174_s12 + $0xf8] sm:$0xff] %v1620_v33  ;;  %v1685_v40 = vmul.f32 0.5, %v1620_v33  ;;  %v5322_v19 = vrot.slane %v1774_v17, %v5120_v5 }
 0x349   : > { %v1745_v43 = vadd.f32 %v1729_v37, %v5261_v36  ;;  %v4145_v36 = vld [vmem:[#allocation11 + $0x168] ss:$16 sps:$4 sm:$0xff]  }
 0x34a   : > { %4200 = vpow2.f32 %v1714_v39  ;;  %v1716_v44 = vmul.f32 1.442695, %v1685_v40  ;;  %2565 = vmatpush1.bf16.msra.mxu1 %v4133_v34 }
 0x34b   : > { %v1755_v47 = vpack.c.bf16 %v1745_v43, %v1744_v38  ;;  %2566 = vmatprep.subr.bf16.mxu1 %v4141_v41 }
 0x34c   : > { %v4197_v49 = vpop.eup %4196  ;;  %4202 = vpow2.f32 %v1716_v44 }
 0x34d   : > { %1949 = vmatmul.mubr.bf16.gmra.mrb[52].mxu1 %v1755_v47  ;;  %v1730_v50 = vmul.f32 %v4197_v49, %v1666_v46 }
 0x34e   : > { %v4199_v51 = vpop.eup %4198  ;;  %1958 = vmatprep.mubr.bf16.mxu1 %v4726_v7  ;;  %2567 = vmatpush1.bf16.msra.mxu1 %v4139_v42 }
 0x34f   : > { %v1731_v52 = vmul.f32 %v4199_v51, %v1667_v29  ;;  %v1746_v53 = vadd.f32 %v1730_v50, %v5273_v56  ;;  %2568 = vmatprep.subr.bf16.mxu1 %v4147_v48 }
 0x351   : > { %v1747_v55 = vadd.f32 %v1731_v52, %v5280_v61 }
 0x352   : > { %2569 = vmatpush1.bf16.msra.mxu1 %v4145_v36 }
 0x353   : > { %v1756_v58 = vpack.c.bf16 %v1747_v55, %v1746_v53  ;;  %2570 = vmatprep.subr.bf16.mxu1 %v4153_v54 }
 0x354   : > { %v4201_v45 = vpop.eup %4200 }
 0x355   : > { %1959 = vmatmul.mubr.bf16.gmra.mrb[56].mxu1 %v1756_v58  ;;  %v1732_v62 = vmul.f32 %v4201_v45, %v1668_v35 }
 0x356   : > { %v4203_v0 = vpop.eup %4202  ;;  %1968 = vmatprep.mubr.bf16.mxu1 %v4726_v7  ;;  %2571 = vmatpush1.bf16.msra.mxu1 %v4151_v57  ;;  %v4171_v7 = vld [vmem:[#allocation11 + $0x1ec] ss:$16 sps:$4 sm:$0xff]  }
 0x357   : > { %v1733_v56 = vmul.f32 %v4203_v0, %v1669_v60  ;;  %v1748_v8 = vadd.f32 %v1732_v62, %v5292_v23  ;;  %2572 = vmatprep.subr.bf16.mxu1 %v4159_v59 }
 0x359   : > { %v1749_v61 = vadd.f32 %v1733_v56, %v1618_v6 }
 0x35a   : > { %2573 = vmatpush1.bf16.msra.mxu1 %v4157_v4 }
 0x35b   : > { %v1757_v1 = vpack.c.bf16 %v1749_v61, %v1748_v8  ;;  %2574 = vmatprep.subr.bf16.mxu1 %v4165_v10 }
 0x35d   : > { %1969 = vmatmul.mubr.bf16.gmra.mrb[60].mxu1 %v1757_v1 }
 0x35e   : > { %2575 = vmatpush1.bf16.msra.mxu1 %v4163_v13 }
 0x35f   : > { %2576 = vmatprep.subr.bf16.mxu1 %v4171_v7 }
 0x362   : > { %2577 = vmatpush1.bf16.msra.mxu1 %v4169_v16 }
 0x3f8   : > { %v1900_v20 = vpop.f32.mrb[32].mxu1 }
 0x3f9   : > { %v1901_v22 = vadd.f32 %v1900_v20, %v5319_v18  ;;  %v1902_v23 = vpop.f32.mrb[33].mxu1 }
 0x3fa   : > { %v1903_v63 = vadd.f32 %v1902_v23, %v5322_v19  ;;  %v1904_v24 = vpop.f32.mrb[34].mxu1 }
 0x3fb   : > { %v1905_v25 = vadd.f32 %v1904_v24, %v5319_v18  ;;  %v1906_v26 = vpop.f32.mrb[35].mxu1  ;;  %v1979_v27 = vmax.f32 %v1901_v22, 0.0 }
 0x3fc   : > { %v1907_v11 = vadd.f32 %v1906_v26, %v5322_v19  ;;  %v1980_v6 = vmax.f32 %v1903_v63, 0.0 }
 0x3fd   : > { %v1981_v28 = vmax.f32 %v1905_v25, 0.0 }
 0x3fe   : > { %v1982_v30 = vmax.f32 %v1907_v11, 0.0 }
 0x3ff   : > { %v2011_v31 = vpack.c.bf16 %v1981_v28, %v1979_v27 }
 0x400   : > { %v2012_v32 = vpack.c.bf16 %v1982_v30, %v1980_v6  ;;  %v1910_v21 = vpop.f32.mrb[36].mxu1 }
 0x401   : > { %v1911_v33 = vadd.f32 %v1910_v21, %v5319_v18  ;;  %v1912_v34 = vpop.f32.mrb[37].mxu1 }
 0x402   : > { %v1913_v37 = vadd.f32 %v1912_v34, %v5322_v19  ;;  %v1914_v38 = vpop.f32.mrb[38].mxu1  ;;  %2465 = vmatprep.mubr.bf16.mxu0 %v2012_v32  ;;  %2578 = vmatprep.mubr.bf16.mxu1 %v2012_v32 }
 0x403   : > { %v1915_v41 = vadd.f32 %v1914_v38, %v5319_v18  ;;  %v1916_v39 = vpop.f32.mrb[39].mxu1  ;;  %2466 = vmatmul.mubr.bf16.vlgmr.msra.gmra.mrb[32].mxu0 %v2011_v31  ;;  %2579 = vmatmul.mubr.bf16.vlgmr.msra.gmra.mrb[64].mxu1 %v2011_v31  ;;  %v1983_v43 = vmax.f32 %v1911_v33, 0.0 }
 0x404   : > { %v1917_v40 = vadd.f32 %v1916_v39, %v5322_v19  ;;  %v1984_v46 = vmax.f32 %v1913_v37, 0.0 }
 0x405   : > { %v1985_v44 = vmax.f32 %v1915_v41, 0.0 }
 0x406   : > { %v1986_v42 = vmax.f32 %v1917_v40, 0.0 }
 0x407   : > { %v2013_v47 = vpack.c.bf16 %v1985_v44, %v1983_v43 }
 0x408   : > { %v2014_v48 = vpack.c.bf16 %v1986_v42, %v1984_v46  ;;  %v1920_v49 = vpop.f32.mrb[40].mxu1 }
 0x409   : > { %v1921_v29 = vadd.f32 %v1920_v49, %v5319_v18  ;;  %v1922_v50 = vpop.f32.mrb[41].mxu1 }
 0x40a   : > { %v1923_v51 = vadd.f32 %v1922_v50, %v5322_v19  ;;  %v1924_v36 = vpop.f32.mrb[42].mxu1  ;;  %2475 = vmatprep.mubr.bf16.mxu0 %v2014_v48  ;;  %2588 = vmatprep.mubr.bf16.mxu1 %v2014_v48 }
 0x40b   : > { %v1925_v52 = vadd.f32 %v1924_v36, %v5319_v18  ;;  %v1926_v53 = vpop.f32.mrb[43].mxu1  ;;  %2476 = vmatmul.mubr.bf16.gmra.mrb[36].mxu0 %v2013_v47  ;;  %2589 = vmatmul.mubr.bf16.gmra.mrb[68].mxu1 %v2013_v47  ;;  %v1987_v55 = vmax.f32 %v1921_v29, 0.0 }
 0x40c   : > { %v1927_v54 = vadd.f32 %v1926_v53, %v5322_v19  ;;  %v1988_v57 = vmax.f32 %v1923_v51, 0.0 }
 0x40d   : > { %v1989_v35 = vmax.f32 %v1925_v52, 0.0 }
 0x40e   : > { %v1990_v58 = vmax.f32 %v1927_v54, 0.0 }
 0x40f   : > { %v2015_v59 = vpack.c.bf16 %v1989_v35, %v1987_v55 }
 0x410   : > { %v2016_v45 = vpack.c.bf16 %v1990_v58, %v1988_v57  ;;  %v1930_v60 = vpop.f32.mrb[44].mxu1 }
 0x411   : > { %v1931_v62 = vadd.f32 %v1930_v60, %v5319_v18  ;;  %v1932_v0 = vpop.f32.mrb[45].mxu1 }
 0x412   : > { %v1933_v4 = vadd.f32 %v1932_v0, %v5322_v19  ;;  %v1934_v56 = vpop.f32.mrb[46].mxu1  ;;  %2485 = vmatprep.mubr.bf16.mxu0 %v2016_v45  ;;  %2598 = vmatprep.mubr.bf16.mxu1 %v2016_v45 }
 0x413   : > { %v1935_v8 = vadd.f32 %v1934_v56, %v5319_v18  ;;  %v1936_v61 = vpop.f32.mrb[47].mxu1  ;;  %2486 = vmatmul.mubr.bf16.gmra.mrb[40].mxu0 %v2015_v59  ;;  %2599 = vmatmul.mubr.bf16.gmra.mrb[72].mxu1 %v2015_v59  ;;  %v1991_v9 = vmax.f32 %v1931_v62, 0.0 }
 0x414   : > { %v1937_v1 = vadd.f32 %v1936_v61, %v5322_v19  ;;  %v1992_v12 = vmax.f32 %v1933_v4, 0.0 }
 0x415   : > { %v1993_v10 = vmax.f32 %v1935_v8, 0.0 }
 0x416   : > { %v1994_v13 = vmax.f32 %v1937_v1, 0.0 }
 0x417   : > { %v2017_v14 = vpack.c.bf16 %v1993_v10, %v1991_v9 }
 0x418   : > { %v2018_v7 = vpack.c.bf16 %v1994_v13, %v1992_v12  ;;  %v1940_v15 = vpop.f32.mrb[48].mxu1  ;;  %v2103_v13 = vsub.s32 2, %v5111_v2 }
 0x419   : > { %v1941_v16 = vadd.f32 %v1940_v15, %v5319_v18  ;;  %v1942_v17 = vpop.f32.mrb[49].mxu1 }
 0x41a   : > { %v1943_v20 = vadd.f32 %v1942_v17, %v5322_v19  ;;  %v1944_v22 = vpop.f32.mrb[50].mxu1  ;;  %2495 = vmatprep.mubr.bf16.mxu0 %v2018_v7  ;;  %2608 = vmatprep.mubr.bf16.mxu1 %v2018_v7 }
 0x41b   : > { %v1945_v23 = vadd.f32 %v1944_v22, %v5319_v18  ;;  %v1946_v63 = vpop.f32.mrb[51].mxu1  ;;  %2496 = vmatmul.mubr.bf16.gmra.mrb[44].mxu0 %v2017_v14  ;;  %2609 = vmatmul.mubr.bf16.gmra.mrb[76].mxu1 %v2017_v14  ;;  %v1995_v25 = vmax.f32 %v1941_v16, 0.0  ;;  %v2107_v14 = vsub.s32 3, %v5111_v2 }
 0x41c   : > { %v1947_v24 = vadd.f32 %v1946_v63, %v5322_v19  ;;  %v1996_v11 = vmax.f32 %v1943_v20, 0.0 }
 0x41d   : > { %v1997_v26 = vmax.f32 %v1945_v23, 0.0 }
 0x41e   : > { %v1998_v27 = vmax.f32 %v1947_v24, 0.0 }
 0x41f   : > { %v2019_v28 = vpack.c.bf16 %v1997_v26, %v1995_v25 }
 0x420   : > { %v2020_v6 = vpack.c.bf16 %v1998_v27, %v1996_v11  ;;  %v1950_v30 = vpop.f32.mrb[52].mxu1 }
 0x421   : > { %v1951_v31 = vadd.f32 %v1950_v30, %v5319_v18  ;;  %v1952_v32 = vpop.f32.mrb[53].mxu1 }
 0x422   : > { %v1953_v21 = vadd.f32 %v1952_v32, %v5322_v19  ;;  %v1954_v33 = vpop.f32.mrb[54].mxu1  ;;  %2505 = vmatprep.mubr.bf16.mxu0 %v2020_v6  ;;  %2618 = vmatprep.mubr.bf16.mxu1 %v2020_v6 }
 0x423   : > { %v1955_v34 = vadd.f32 %v1954_v33, %v5319_v18  ;;  %v1956_v37 = vpop.f32.mrb[55].mxu1  ;;  %2506 = vmatmul.mubr.bf16.gmra.mrb[48].mxu0 %v2019_v28  ;;  %2619 = vmatmul.mubr.bf16.gmra.mrb[80].mxu1 %v2019_v28  ;;  %v1999_v41 = vmax.f32 %v1951_v31, 0.0 }
 0x424   : > { %v1957_v38 = vadd.f32 %v1956_v37, %v5322_v19  ;;  %v2000_v40 = vmax.f32 %v1953_v21, 0.0 }
 0x425   : > { %v2001_v39 = vmax.f32 %v1955_v34, 0.0 }
 0x426   : > { %v2002_v43 = vmax.f32 %v1957_v38, 0.0 }
 0x427   : > { %v2021_v44 = vpack.c.bf16 %v2001_v39, %v1999_v41 }
 0x428   : > { %v2022_v46 = vpack.c.bf16 %v2002_v43, %v2000_v40  ;;  %v1960_v42 = vpop.f32.mrb[56].mxu1 }
 0x429   : > { %v1961_v47 = vadd.f32 %v1960_v42, %v5319_v18  ;;  %v1962_v48 = vpop.f32.mrb[57].mxu1 }
 0x42a   : > { %v1963_v49 = vadd.f32 %v1962_v48, %v5322_v19  ;;  %v1964_v29 = vpop.f32.mrb[58].mxu1  ;;  %2515 = vmatprep.mubr.bf16.mxu0 %v2022_v46  ;;  %2628 = vmatprep.mubr.bf16.mxu1 %v2022_v46 }
 0x42b   : > { %v1965_v50 = vadd.f32 %v1964_v29, %v5319_v18  ;;  %v1966_v51 = vpop.f32.mrb[59].mxu1  ;;  %2516 = vmatmul.mubr.bf16.gmra.mrb[52].mxu0 %v2021_v44  ;;  %2629 = vmatmul.mubr.bf16.gmra.mrb[84].mxu1 %v2021_v44  ;;  %v2003_v52 = vmax.f32 %v1961_v47, 0.0 }
 0x42c   : > { %v1967_v36 = vadd.f32 %v1966_v51, %v5322_v19  ;;  %v2004_v54 = vmax.f32 %v1963_v49, 0.0 }
 0x42d   : > { %v2005_v53 = vmax.f32 %v1965_v50, 0.0 }
 0x42e   : > { %v2006_v55 = vmax.f32 %v1967_v36, 0.0 }
 0x42f   : > { %v2023_v35 = vpack.c.bf16 %v2005_v53, %v2003_v52 }
 0x430   : > { %v2024_v57 = vpack.c.bf16 %v2006_v55, %v2004_v54  ;;  %v1970_v58 = vpop.f32.mrb[60].mxu1 }
 0x431   : > { %v1971_v59 = vadd.f32 %v1970_v58, %v5319_v18  ;;  %v1972_v45 = vpop.f32.mrb[61].mxu1 }
 0x432   : > { %v1973_v60 = vadd.f32 %v1972_v45, %v5322_v19  ;;  %v1974_v62 = vpop.f32.mrb[62].mxu1  ;;  %2525 = vmatprep.mubr.bf16.mxu0 %v2024_v57  ;;  %2638 = vmatprep.mubr.bf16.mxu1 %v2024_v57 }
 0x433   : > { %v1975_v0 = vadd.f32 %v1974_v62, %v5319_v18  ;;  %v1976_v4 = vpop.f32.mrb[63].mxu1  ;;  %2526 = vmatmul.mubr.bf16.gmra.mrb[56].mxu0 %v2023_v35  ;;  %2639 = vmatmul.mubr.bf16.gmra.mrb[88].mxu1 %v2023_v35  ;;  %v2007_v8 = vmax.f32 %v1971_v59, 0.0  ;;  %v2091_v18 = vld [vmem:[%s5654_s6 + $0x6] sm:$0xf] }
 0x434   : > { %v1977_v56 = vadd.f32 %v1976_v4, %v5322_v19  ;;  %v2008_v1 = vmax.f32 %v1973_v60, 0.0  ;;  %v5362_v19 = vrot.slane %v2091_v18, %v5114_v3  ;;  %v5364_v7 = vrot.slane %v2091_v18, %v2103_v13 }
 0x435   : > { %v2009_v61 = vmax.f32 %v1975_v0, 0.0  ;;  %v5367_v15 = vrot.slane %v2091_v18, %v5120_v5  ;;  %v5369_v16 = vrot.slane %v2091_v18, %v2107_v14 }
 0x436   : > { %v2010_v9 = vmax.f32 %v1977_v56, 0.0 }
 0x437   : > { %v2025_v10 = vpack.c.bf16 %v2009_v61, %v2007_v8 }
 0x438   : > { %v2026_v12 = vpack.c.bf16 %v2010_v9, %v2008_v1 }
 0x43a   : > { %2535 = vmatprep.mubr.bf16.mxu0 %v2026_v12  ;;  %2648 = vmatprep.mubr.bf16.mxu1 %v2026_v12 }
 0x43b   : > { %2536 = vmatmul.mubr.bf16.gmra.mrb[60].mxu0 %v2025_v10  ;;  %2649 = vmatmul.mubr.bf16.gmra.mrb[92].mxu1 %v2025_v10 }
 0x4d6   : > { %v2467_v17 = vpop.f32.mrb[32].mxu0  ;;  %v2580_v20 = vpop.f32.mrb[64].mxu1 }
 0x4d7   : > { %v2468_v22 = vadd.f32 %v2467_v17, %v5362_v19  ;;  %v2581_v23 = vadd.f32 %v2580_v20, %v5364_v7  ;;  %v2469_v63 = vpop.f32.mrb[33].mxu0  ;;  %v2582_v24 = vpop.f32.mrb[65].mxu1 }
 0x4d8   : > { %v2470_v2 = vadd.f32 %v2469_v63, %v5367_v15  ;;  %v2583_v3 = vadd.f32 %v2582_v24, %v5369_v16  ;;  %v2471_v25 = vpop.f32.mrb[34].mxu0  ;;  %v2584_v26 = vpop.f32.mrb[66].mxu1 }
 0x4d9   : > { %v2659_v11 = vsub.f32 0.0, %v2468_v22  ;;  %v2661_v27 = vsub.f32 0.0, %v2581_v23  ;;  %v2472_v5 = vadd.f32 %v2471_v25, %v5362_v19  ;;  %v2585_v28 = vadd.f32 %v2584_v26, %v5364_v7  ;;  %v2473_v6 = vpop.f32.mrb[35].mxu0  ;;  %v2586_v30 = vpop.f32.mrb[67].mxu1 }
 0x4da   : > { %v2660_v31 = vsub.f32 0.0, %v2470_v2  ;;  %v2662_v32 = vsub.f32 0.0, %v2583_v3  ;;  %v2474_v21 = vadd.f32 %v2473_v6, %v5367_v15  ;;  %v2587_v33 = vadd.f32 %v2586_v30, %v5369_v16 }
 0x4db   : > { %v2723_v34 = vmul.f32 1.442695, %v2659_v11  ;;  %v2727_v37 = vmul.f32 1.442695, %v2661_v27  ;;  %v2663_v38 = vsub.f32 0.0, %v2472_v5  ;;  %v2665_v41 = vsub.f32 0.0, %v2585_v28 }
 0x4dc   : > { %v2725_v39 = vmul.f32 1.442695, %v2660_v31  ;;  %v2729_v40 = vmul.f32 1.442695, %v2662_v32  ;;  %v2664_v43 = vsub.f32 0.0, %v2474_v21  ;;  %v2666_v44 = vsub.f32 0.0, %v2587_v33 }
 0x4dd   : > { %4204 = vpow2.f32 %v2723_v34  ;;  %v2731_v46 = vmul.f32 1.442695, %v2663_v38  ;;  %v2735_v42 = vmul.f32 1.442695, %v2665_v41 }
 0x4de   : > { %4206 = vpow2.f32 %v2727_v37  ;;  %v2477_v47 = vpop.f32.mrb[36].mxu0  ;;  %v2590_v48 = vpop.f32.mrb[68].mxu1  ;;  %v2733_v49 = vmul.f32 1.442695, %v2664_v43  ;;  %v2737_v52 = vmul.f32 1.442695, %v2666_v44 }
 0x4df   : > { %4208 = vpow2.f32 %v2725_v39  ;;  %v2478_v29 = vadd.f32 %v2477_v47, %v5362_v19  ;;  %v2591_v50 = vadd.f32 %v2590_v48, %v5364_v7  ;;  %v2479_v51 = vpop.f32.mrb[37].mxu0  ;;  %v2592_v36 = vpop.f32.mrb[69].mxu1 }
 0x4e0   : > { %4210 = vpow2.f32 %v2729_v40  ;;  %v2480_v53 = vadd.f32 %v2479_v51, %v5367_v15  ;;  %v2593_v54 = vadd.f32 %v2592_v36, %v5369_v16  ;;  %v2481_v55 = vpop.f32.mrb[38].mxu0  ;;  %v2594_v35 = vpop.f32.mrb[70].mxu1 }
 0x4e1   : > { %4212 = vpow2.f32 %v2731_v46  ;;  %v2667_v57 = vsub.f32 0.0, %v2478_v29  ;;  %v2669_v58 = vsub.f32 0.0, %v2591_v50  ;;  %v2482_v59 = vadd.f32 %v2481_v55, %v5362_v19  ;;  %v2483_v45 = vpop.f32.mrb[39].mxu0  ;;  %v2596_v60 = vpop.f32.mrb[71].mxu1 }
 0x4e2   : > { %4214 = vpow2.f32 %v2735_v42  ;;  %v2668_v62 = vsub.f32 0.0, %v2480_v53  ;;  %v2670_v0 = vsub.f32 0.0, %v2593_v54  ;;  %v2595_v18 = vadd.f32 %v2594_v35, %v5364_v7 }
 0x4e3   : > { %4216 = vpow2.f32 %v2733_v49  ;;  %v2739_v4 = vmul.f32 1.442695, %v2667_v57  ;;  %v2743_v56 = vmul.f32 1.442695, %v2669_v58  ;;  %v2671_v8 = vsub.f32 0.0, %v2482_v59 }
 0x4e4   : > { %4218 = vpow2.f32 %v2737_v52  ;;  %v2741_v61 = vmul.f32 1.442695, %v2668_v62  ;;  %v2745_v1 = vmul.f32 1.442695, %v2670_v0  ;;  %v2484_v23 = vadd.f32 %v2483_v45, %v5367_v15 }
 0x4e5   : > { %4220 = vpow2.f32 %v2739_v4  ;;  %v2747_v9 = vmul.f32 1.442695, %v2671_v8  ;;  %v2673_v6 = vsub.f32 0.0, %v2595_v18  ;;  %v2597_v30 = vadd.f32 %v2596_v60, %v5369_v16 }
 0x4e6   : > { %4222 = vpow2.f32 %v2743_v56  ;;  %v2487_v10 = vpop.f32.mrb[40].mxu0  ;;  %v2600_v12 = vpop.f32.mrb[72].mxu1  ;;  %v2672_v21 = vsub.f32 0.0, %v2484_v23 }
 0x4e7   : > { %v4205_v13 = vpop.eup %4204  ;;  %4224 = vpow2.f32 %v2741_v61  ;;  %v2489_v14 = vpop.f32.mrb[41].mxu0  ;;  %v2488_v37 = vadd.f32 %v2487_v10, %v5362_v19  ;;  %v2601_v39 = vadd.f32 %v2600_v12, %v5364_v7  ;;  %v2751_v42 = vmul.f32 1.442695, %v2673_v6 }
 0x4e8   : > { %v2602_v17 = vpop.f32.mrb[73].mxu1  ;;  %v4207_v20 = vpop.eup %4206  ;;  %v2851_v22 = vadd.f32 1.0, %v4205_v13  ;;  %4226 = vpow2.f32 %v2745_v1  ;;  %v2674_v47 = vsub.f32 0.0, %v2597_v30  ;;  %v2749_v51 = vmul.f32 1.442695, %v2672_v21 }
 0x4e9   : > { %v2491_v63 = vpop.f32.mrb[42].mxu0  ;;  %v2604_v24 = vpop.f32.mrb[74].mxu1  ;;  %v2853_v3 = vadd.f32 1.0, %v4207_v20  ;;  %4228 = vpow2.f32 %v2747_v9  ;;  %v2490_v36 = vadd.f32 %v2489_v14, %v5367_v15  ;;  %v2675_v35 = vsub.f32 0.0, %v2488_v37 }
 0x4ea   : > { %v4209_v2 = vpop.eup %4208  ;;  %v2493_v25 = vpop.f32.mrb[43].mxu0  ;;  %4230 = vrcp.f32 %v2851_v22  ;;  %v2603_v57 = vadd.f32 %v2602_v17, %v5369_v16  ;;  %v2677_v62 = vsub.f32 0.0, %v2601_v39  ;;  %v2492_v0 = vadd.f32 %v2491_v63, %v5362_v19 }
 0x4eb   : > { %v4211_v26 = vpop.eup %4210  ;;  %v2852_v11 = vadd.f32 1.0, %v4209_v2  ;;  %v2606_v27 = vpop.f32.mrb[75].mxu1  ;;  %4232 = vrcp.f32 %v2853_v3  ;;  %v2753_v8 = vmul.f32 1.442695, %v2674_v47  ;;  %v2605_v61 = vadd.f32 %v2604_v24, %v5364_v7 }
 0x4ec   : > { %v4213_v5 = vpop.eup %4212  ;;  %v2854_v28 = vadd.f32 1.0, %v4211_v26  ;;  %v2676_v10 = vsub.f32 0.0, %v2490_v36  ;;  %v2494_v12 = vadd.f32 %v2493_v25, %v5367_v15  ;;  %v2755_v18 = vmul.f32 1.442695, %v2675_v35 }
 0x4ed   : > { %v4215_v31 = vpop.eup %4214  ;;  %4234 = vrcp.f32 %v2852_v11  ;;  %v2855_v32 = vadd.f32 1.0, %v4213_v5  ;;  %v2678_v14 = vsub.f32 0.0, %v2603_v57  ;;  %v2607_v17 = vadd.f32 %v2606_v27, %v5369_v16 }
 0x4ee   : > { %v4217_v33 = vpop.eup %4216  ;;  %4236 = vrcp.f32 %v2854_v28  ;;  %v2857_v34 = vadd.f32 1.0, %v4215_v31  ;;  %v2497_v40 = vpop.f32.mrb[44].mxu0  ;;  %v2759_v22 = vmul.f32 1.442695, %v2677_v62  ;;  %v2679_v23 = vsub.f32 0.0, %v2492_v0 }
 0x4ef   : > { %v4219_v38 = vpop.eup %4218  ;;  %4238 = vrcp.f32 %v2855_v32  ;;  %v2856_v41 = vadd.f32 1.0, %v4217_v33  ;;  %v2610_v43 = vpop.f32.mrb[76].mxu1  ;;  %v2498_v63 = vadd.f32 %v2497_v40, %v5362_v19  ;;  %v2681_v25 = vsub.f32 0.0, %v2605_v61 }
 0x4f0   : > { %v4221_v44 = vpop.eup %4220  ;;  %4240 = vrcp.f32 %v2857_v34  ;;  %v2858_v46 = vadd.f32 1.0, %v4219_v38  ;;  %v5389_v48 = vpop.f32.mrb[45].mxu0  ;;  %v2611_v11 = vadd.f32 %v2610_v43, %v5364_v7  ;;  %v2757_v30 = vmul.f32 1.442695, %v2676_v10 }
 0x4f1   : > { %v5391_v49 = vpop.f32.mrb[77].mxu1  ;;  %v4223_v29 = vpop.eup %4222  ;;  %4242 = vrcp.f32 %v2856_v41  ;;  %v2859_v50 = vadd.f32 1.0, %v4221_v44  ;;  %v2680_v31 = vsub.f32 0.0, %v2494_v12  ;;  %v2761_v34 = vmul.f32 1.442695, %v2678_v14 }
 0x4f2   : > { %v5394_v52 = vpop.f32.mrb[46].mxu0  ;;  %v5396_v53 = vpop.f32.mrb[78].mxu1  ;;  %4244 = vrcp.f32 %v2858_v46  ;;  %v2861_v55 = vadd.f32 1.0, %v4223_v29  ;;  %v2682_v37 = vsub.f32 0.0, %v2607_v17  ;;  %v2763_v39 = vmul.f32 1.442695, %v2679_v23 }
 0x4f3   : > { %v4225_v54 = vpop.eup %4224  ;;  %v5399_v58 = vpop.f32.mrb[47].mxu0  ;;  %4246 = vrcp.f32 %v2859_v50  ;;  %v2683_v40 = vsub.f32 0.0, %v2498_v63  ;;  %v2685_v47 = vsub.f32 0.0, %v2611_v11  ;;  %v2500_v12 = vadd.f32 %v5389_v48, %v5367_v15 }
 0x4f4   : > { %v5401_v59 = vpop.f32.mrb[79].mxu1  ;;  %v4227_v45 = vpop.eup %4226  ;;  %v2860_v60 = vadd.f32 1.0, %v4225_v54  ;;  %4248 = vrcp.f32 %v2861_v55  ;;  %v2769_v54 = vmul.f32 1.442695, %v2682_v37  ;;  %v2502_v48 = vadd.f32 %v5394_v52, %v5362_v19 }
 0x4f5   : > { %v4229_v4 = vpop.eup %4228  ;;  %v2862_v56 = vadd.f32 1.0, %v4227_v45  ;;  %v2771_v35 = vmul.f32 1.442695, %v2683_v40  ;;  %v2775_v0 = vmul.f32 1.442695, %v2685_v47  ;;  %v2684_v11 = vsub.f32 0.0, %v2500_v12 }
 0x4f6   : > { %v4231_v1 = vpop.eup %4230  ;;  %4250 = vrcp.f32 %v2860_v60  ;;  %v2863_v9 = vadd.f32 1.0, %v4229_v4  ;;  %v5408_v2 = vpop.f32.mrb[48].mxu0  ;;  %v2615_v37 = vadd.f32 %v5396_v53, %v5364_v7  ;;  %v2504_v52 = vadd.f32 %v5399_v58, %v5367_v15 }
 0x4f7   : > { %v4233_v13 = vpop.eup %4232  ;;  %4252 = vrcp.f32 %v2862_v56  ;;  %v5410_v24 = vpop.f32.mrb[80].mxu1  ;;  %v2617_v53 = vadd.f32 %v5401_v59, %v5369_v16 }
 0x4f8   : > { %v4235_v20 = vpop.eup %4234  ;;  %4254 = vrcp.f32 %v2863_v9  ;;  %v5413_v5 = vpop.f32.mrb[49].mxu0 }
 0x4f9   : > { %v4237_v3 = vpop.eup %4236  ;;  %v3663_v26 = vpack.c.bf16 %v4235_v20, %v4231_v1  ;;  %4256 = vpow2.f32 %v2751_v42  ;;  %v5415_v27 = vpop.f32.mrb[81].mxu1  ;;  %v2767_v42 = vmul.f32 1.442695, %v2681_v25  ;;  %v2613_v20 = vadd.f32 %v5391_v49, %v5369_v16 }
 0x4fa   : > { %v4239_v28 = vpop.eup %4238  ;;  %v3664_v6 = vpack.c.bf16 %v4237_v3, %v4233_v13  ;;  %4258 = vpow2.f32 %v2749_v51  ;;  %v5417_v32 = vpop.f32.mrb[50].mxu0  ;;  %v2765_v51 = vmul.f32 1.442695, %v2680_v31 }
 0x4fb   : > { %v5419_v21 = vpop.f32.mrb[82].mxu1  ;;  %v4241_v33 = vpop.eup %4240  ;;  %3171 = vst [vmem:[%s5423_s0] sm:$0xff] %v3663_v26  ;;  %4260 = vpow2.f32 %v2753_v8 }
 0x4fc   : > { %v5426_v38 = vpop.f32.mrb[51].mxu0  ;;  %v4243_v41 = vpop.eup %4242  ;;  %3172 = vst [vmem:[%s5423_s0 + $0x8] sm:$0xff] %v3664_v6  ;;  %4262 = vpow2.f32 %v2755_v18 }
 0x4fd   : > { %v5429_v43 = vpop.f32.mrb[83].mxu1  ;;  %v4245_v44 = vpop.eup %4244  ;;  %v3665_v46 = vpack.c.bf16 %v4243_v41, %v4239_v28  ;;  %4264 = vpow2.f32 %v2759_v22 }
 0x4fe   : > { %v4247_v29 = vpop.eup %4246  ;;  %v3666_v50 = vpack.c.bf16 %v4245_v44, %v4241_v33  ;;  %4266 = vpow2.f32 %v2757_v30  ;;  %v5433_v57 = vpop.f32.mrb[52].mxu0  ;;  %v2686_v30 = vsub.f32 0.0, %v2613_v20 }
 0x4ff   : > { %v4249_v36 = vpop.eup %4248  ;;  %3173 = vst [vmem:[%s5423_s0 + $0x10] sm:$0xff] %v3665_v46  ;;  %4268 = vpow2.f32 %v2761_v34  ;;  %v5435_v45 = vpop.f32.mrb[84].mxu1  ;;  %v2687_v46 = vsub.f32 0.0, %v2502_v48 }
 0x500   : > { %v4251_v55 = vpop.eup %4250  ;;  %3174 = vst [vmem:[%s5423_s0 + $0x18] sm:$0xff] %v3666_v50  ;;  %4270 = vpow2.f32 %v2763_v39  ;;  %v5437_v4 = vpop.f32.mrb[53].mxu0 }
 0x501   : > { %v4253_v60 = vpop.eup %4252  ;;  %v3667_v62 = vpack.c.bf16 %v4251_v55, %v4247_v29  ;;  %4272 = vpow2.f32 %v2767_v42  ;;  %v5439_v56 = vpop.f32.mrb[85].mxu1  ;;  %v2779_v59 = vmul.f32 1.442695, %v2687_v46 }
 0x502   : > { %v5441_v8 = vpop.eup %4254  ;;  %v3668_v61 = vpack.c.bf16 %v4253_v60, %v4249_v36  ;;  %4274 = vpow2.f32 %v2765_v51  ;;  %v5443_v1 = vpop.f32.mrb[54].mxu0  ;;  %v2773_v51 = vmul.f32 1.442695, %v2684_v11  ;;  %v2508_v60 = vadd.f32 %v5408_v2, %v5362_v19 }
 0x503   : > { %v5445_v9 = vpop.f32.mrb[86].mxu1  ;;  %v4257_v10 = vpop.eup %4256  ;;  %3175 = vst [vmem:[%s5423_s0 + $0x20] sm:$0xff] %v3667_v62  ;;  %4276 = vpow2.f32 %v2769_v54 }
 0x504   : > { %v5450_v13 = vpop.f32.mrb[55].mxu0  ;;  %v5452_v18 = vpop.f32.mrb[87].mxu1  ;;  %3176 = vst [vmem:[%s5423_s0 + $0x28] sm:$0xff] %v3668_v61  ;;  %v2865_v17 = vadd.f32 1.0, %v4257_v10  ;;  %4278 = vpow2.f32 %v2771_v35  ;;  %v2777_v35 = vmul.f32 1.442695, %v2686_v30  ;;  %v2512_v30 = vadd.f32 %v5417_v32, %v5362_v19 }
 0x505   : > { %v4259_v14 = vpop.eup %4258  ;;  %4280 = vpow2.f32 %v2775_v0  ;;  %v2689_v61 = vsub.f32 0.0, %v2615_v37  ;;  %v2688_v10 = vsub.f32 0.0, %v2504_v52  ;;  %v2691_v48 = vsub.f32 0.0, %v2508_v60 }
 0x506   : > { %v4261_v22 = vpop.eup %4260  ;;  %v2864_v23 = vadd.f32 1.0, %v4259_v14  ;;  %4282 = vrcp.f32 %v2865_v17  ;;  %v5459_v31 = vpop.f32.mrb[56].mxu0  ;;  %v2621_v17 = vadd.f32 %v5410_v24, %v5364_v7  ;;  %v2625_v52 = vadd.f32 %v5419_v21, %v5364_v7 }
 0x507   : > { %v4263_v63 = vpop.eup %4262  ;;  %v2866_v3 = vadd.f32 1.0, %v4261_v22  ;;  %v5461_v49 = vpop.f32.mrb[88].mxu1  ;;  %v2783_v24 = vmul.f32 1.442695, %v2689_v61 }
 0x508   : > { %v4265_v26 = vpop.eup %4264  ;;  %4284 = vrcp.f32 %v2864_v23  ;;  %v2867_v25 = vadd.f32 1.0, %v4263_v63  ;;  %v5467_v41 = vpop.f32.mrb[57].mxu0  ;;  %v2690_v23 = vsub.f32 0.0, %v2617_v53  ;;  %v2510_v63 = vadd.f32 %v5413_v5, %v5367_v15 }
 0x509   : > { %v4267_v28 = vpop.eup %4266  ;;  %4286 = vrcp.f32 %v2866_v3  ;;  %v2869_v6 = vadd.f32 1.0, %v4265_v26  ;;  %v5469_v39 = vpop.f32.mrb[89].mxu1  ;;  %v2623_v26 = vadd.f32 %v5415_v27, %v5369_v16  ;;  %v2693_v27 = vsub.f32 0.0, %v2621_v17 }
 0x50a   : > { %v4269_v33 = vpop.eup %4268  ;;  %4288 = vrcp.f32 %v2867_v25  ;;  %v2868_v34 = vadd.f32 1.0, %v4267_v28  ;;  %v5471_v42 = vpop.f32.mrb[58].mxu0  ;;  %v2785_v21 = vmul.f32 1.442695, %v2690_v23 }
 0x50b   : > { %v4271_v40 = vpop.eup %4270  ;;  %4290 = vrcp.f32 %v2869_v6  ;;  %v2870_v44 = vadd.f32 1.0, %v4269_v33  ;;  %v5473_v47 = vpop.f32.mrb[90].mxu1  ;;  %v2781_v6 = vmul.f32 1.442695, %v2688_v10  ;;  %v2697_v10 = vsub.f32 0.0, %v2625_v52 }
 0x50c   : > { %v4273_v29 = vpop.eup %4272  ;;  %4292 = vrcp.f32 %v2868_v34  ;;  %v2871_v50 = vadd.f32 1.0, %v4271_v40  ;;  %v5477_v58 = vpop.f32.mrb[59].mxu0 }
 0x50d   : > { %v5479_v36 = vpop.f32.mrb[91].mxu1  ;;  %v4275_v54 = vpop.eup %4274  ;;  %4294 = vrcp.f32 %v2870_v44  ;;  %v2873_v55 = vadd.f32 1.0, %v4273_v29  ;;  %v2692_v29 = vsub.f32 0.0, %v2510_v63 }
 0x50e   : > { %v4277_v62 = vpop.eup %4276  ;;  %4296 = vrcp.f32 %v2871_v50  ;;  %v2872_v0 = vadd.f32 1.0, %v4275_v54  ;;  %v5489_v25 = vpop.f32.mrb[60].mxu0  ;;  %v2514_v50 = vadd.f32 %v5426_v38, %v5367_v15  ;;  %v2791_v38 = vmul.f32 1.442695, %v2693_v27 }
 0x50f   : > { %v4279_v12 = vpop.eup %4278  ;;  %4298 = vrcp.f32 %v2873_v55  ;;  %v2874_v14 = vadd.f32 1.0, %v4277_v62  ;;  %v5491_v11 = vpop.f32.mrb[92].mxu1  ;;  %v2694_v55 = vsub.f32 0.0, %v2623_v26  ;;  %v2787_v62 = vmul.f32 1.442695, %v2691_v48 }
 0x510   : > { %v4281_v20 = vpop.eup %4280  ;;  %4300 = vrcp.f32 %v2872_v0  ;;  %v2875_v22 = vadd.f32 1.0, %v4279_v12  ;;  %v5495_v33 = vpop.f32.mrb[61].mxu0  ;;  %v2695_v0 = vsub.f32 0.0, %v2512_v30  ;;  %v2789_v17 = vmul.f32 1.442695, %v2692_v29 }
 0x511   : > { %v4283_v2 = vpop.eup %4282  ;;  %4302 = vrcp.f32 %v2874_v14  ;;  %v2877_v3 = vadd.f32 1.0, %v4281_v20  ;;  %v5497_v5 = vpop.f32.mrb[93].mxu1  ;;  %v2696_v20 = vsub.f32 0.0, %v2514_v50  ;;  %v2627_v30 = vadd.f32 %v5429_v43, %v5369_v16 }
 0x512   : > { %v4285_v28 = vpop.eup %4284  ;;  %4304 = vrcp.f32 %v2875_v22  ;;  %v5502_v40 = vpop.f32.mrb[62].mxu0  ;;  %v2793_v22 = vmul.f32 1.442695, %v2694_v55  ;;  %v2518_v27 = vadd.f32 %v5433_v57, %v5362_v19 }
 0x513   : > { %v4287_v34 = vpop.eup %4286  ;;  %v3669_v37 = vpack.c.bf16 %v4285_v28, %v5441_v8  ;;  %4306 = vrcp.f32 %v2877_v3  ;;  %v5504_v44 = vpop.f32.mrb[94].mxu1  ;;  %v2799_v3 = vmul.f32 1.442695, %v2697_v10  ;;  %v2797_v28 = vmul.f32 1.442695, %v2696_v20 }
 0x514   : > { %v4289_v46 = vpop.eup %4288  ;;  %v3670_v32 = vpack.c.bf16 %v4287_v34, %v4283_v2  ;;  %4308 = vpow2.f32 %v2773_v51  ;;  %v5508_v53 = vpop.f32.mrb[63].mxu0  ;;  %v2698_v55 = vsub.f32 0.0, %v2627_v30  ;;  %v2699_v57 = vsub.f32 0.0, %v2518_v27 }
 0x515   : > { %v5510_v8 = vpop.f32.mrb[95].mxu1  ;;  %v4291_v54 = vpop.eup %4290  ;;  %3177 = vst [vmem:[%s5423_s0 + $0x30] sm:$0xff] %v3669_v37  ;;  %4310 = vpow2.f32 %v2777_v35 }
 0x516   : > { %v4293_v60 = vpop.eup %4292  ;;  %3178 = vst [vmem:[%s5423_s0 + $0x38] sm:$0xff] %v3670_v32  ;;  %4312 = vpow2.f32 %v2779_v59  ;;  %v2795_v59 = vmul.f32 1.442695, %v2695_v0  ;;  %v2631_v32 = vadd.f32 %v5435_v45, %v5364_v7 }
 0x517   : > { %v4295_v51 = vpop.eup %4294  ;;  %v3671_v61 = vpack.c.bf16 %v4293_v60, %v4289_v46  ;;  %4314 = vpow2.f32 %v2783_v24 }
 0x518   : > { %v4297_v12 = vpop.eup %4296  ;;  %v3672_v14 = vpack.c.bf16 %v4295_v51, %v4291_v54  ;;  %4316 = vpow2.f32 %v2781_v6  ;;  %v2520_v54 = vadd.f32 %v5437_v4, %v5367_v15  ;;  %v2801_v4 = vmul.f32 1.442695, %v2698_v55 }
 0x519   : > { %v4299_v35 = vpop.eup %4298  ;;  %3179 = vst [vmem:[%s5423_s0 + $0x40] sm:$0xff] %v3671_v61  ;;  %4318 = vpow2.f32 %v2785_v21  ;;  %v2701_v61 = vsub.f32 0.0, %v2631_v32 }
 0x51a   : > { %v4301_v23 = vpop.eup %4300  ;;  %3180 = vst [vmem:[%s5423_s0 + $0x48] sm:$0xff] %v3672_v14  ;;  %4320 = vpow2.f32 %v2787_v62  ;;  %v2700_v10 = vsub.f32 0.0, %v2520_v54 }
 0x51b   : > { %v4303_v63 = vpop.eup %4302  ;;  %v3673_v2 = vpack.c.bf16 %v4301_v23, %v4297_v12  ;;  %4322 = vpow2.f32 %v2791_v38  ;;  %v2522_v23 = vadd.f32 %v5443_v1, %v5362_v19  ;;  %v2637_v1 = vadd.f32 %v5452_v18, %v5369_v16 }
 0x51c   : > { %v5516_v48 = vpop.eup %4304  ;;  %v3674_v26 = vpack.c.bf16 %v4303_v63, %v4299_v35  ;;  %4324 = vpow2.f32 %v2789_v17  ;;  %v2633_v17 = vadd.f32 %v5439_v56, %v5369_v16  ;;  %v2524_v56 = vadd.f32 %v5450_v13, %v5367_v15 }
 0x51d   : > { %v5518_v24 = vpop.eup %4306  ;;  %3181 = vst [vmem:[%s5423_s0 + $0x50] sm:$0xff] %v3673_v2  ;;  %4326 = vpow2.f32 %v2793_v22  ;;  %v2803_v22 = vmul.f32 1.442695, %v2699_v57  ;;  %v2807_v2 = vmul.f32 1.442695, %v2701_v61 }
 0x51e   : > { %v4309_v6 = vpop.eup %4308  ;;  %3182 = vst [vmem:[%s5423_s0 + $0x58] sm:$0xff] %v3674_v26  ;;  %4328 = vpow2.f32 %v2795_v59 }
 0x51f   : > { %v4311_v34 = vpop.eup %4310  ;;  %v2876_v37 = vadd.f32 1.0, %v4309_v6  ;;  %4330 = vpow2.f32 %v2799_v3  ;;  %v2635_v3 = vadd.f32 %v5445_v9, %v5364_v7  ;;  %v2805_v6 = vmul.f32 1.442695, %v2700_v10 }
 0x520   : > { %v4313_v52 = vpop.eup %4312  ;;  %v2878_v46 = vadd.f32 1.0, %v4311_v34  ;;  %4332 = vpow2.f32 %v2797_v28  ;;  %v2528_v9 = vadd.f32 %v5459_v31, %v5362_v19 }
 0x521   : > { %v4315_v29 = vpop.eup %4314  ;;  %4334 = vrcp.f32 %v2876_v37  ;;  %v2879_v50 = vadd.f32 1.0, %v4313_v52  ;;  %v2702_v37 = vsub.f32 0.0, %v2633_v17  ;;  %v2705_v13 = vsub.f32 0.0, %v2635_v3 }
 0x522   : > { %v4317_v21 = vpop.eup %4316  ;;  %4336 = vrcp.f32 %v2878_v46  ;;  %v2881_v43 = vadd.f32 1.0, %v4315_v29  ;;  %v2703_v46 = vsub.f32 0.0, %v2522_v23  ;;  %v2707_v57 = vsub.f32 0.0, %v2528_v9 }
 0x523   : > { %v4319_v60 = vpop.eup %4318  ;;  %4338 = vrcp.f32 %v2879_v50  ;;  %v2880_v62 = vadd.f32 1.0, %v4317_v21  ;;  %v2641_v50 = vadd.f32 %v5461_v49, %v5364_v7  ;;  %v2704_v21 = vsub.f32 0.0, %v2524_v56 }
 0x524   : > { %v4321_v0 = vpop.eup %4320  ;;  %4340 = vrcp.f32 %v2881_v43  ;;  %v2882_v51 = vadd.f32 1.0, %v4319_v60  ;;  %v2530_v43 = vadd.f32 %v5467_v41, %v5367_v15  ;;  %v2809_v31 = vmul.f32 1.442695, %v2702_v37 }
 0x525   : > { %v4323_v38 = vpop.eup %4322  ;;  %4342 = vrcp.f32 %v2880_v62  ;;  %v2883_v45 = vadd.f32 1.0, %v4321_v0  ;;  %v2706_v60 = vsub.f32 0.0, %v2637_v1  ;;  %v2811_v49 = vmul.f32 1.442695, %v2703_v46 }
 0x526   : > { %v4325_v12 = vpop.eup %4324  ;;  %4344 = vrcp.f32 %v2882_v51  ;;  %v2885_v14 = vadd.f32 1.0, %v4323_v38  ;;  %v2815_v51 = vmul.f32 1.442695, %v2705_v13  ;;  %v2709_v41 = vsub.f32 0.0, %v2641_v50 }
 0x527   : > { %v4327_v20 = vpop.eup %4326  ;;  %4346 = vrcp.f32 %v2883_v45  ;;  %v2884_v35 = vadd.f32 1.0, %v4325_v12  ;;  %v2813_v45 = vmul.f32 1.442695, %v2704_v21  ;;  %v2708_v10 = vsub.f32 0.0, %v2530_v43 }
 0x528   : > { %v4329_v59 = vpop.eup %4328  ;;  %4348 = vrcp.f32 %v2885_v14  ;;  %v2886_v63 = vadd.f32 1.0, %v4327_v20  ;;  %v2819_v17 = vmul.f32 1.442695, %v2707_v57  ;;  %v2532_v56 = vadd.f32 %v5471_v42, %v5362_v19 }
 0x529   : > { %v4331_v26 = vpop.eup %4330  ;;  %4350 = vrcp.f32 %v2884_v35  ;;  %v2887_v28 = vadd.f32 1.0, %v4329_v59  ;;  %v2645_v37 = vadd.f32 %v5473_v47, %v5364_v7  ;;  %v2534_v42 = vadd.f32 %v5477_v58, %v5367_v15 }
 0x52a   : > { %v4333_v30 = vpop.eup %4332  ;;  %4352 = vrcp.f32 %v2886_v63  ;;  %v2889_v34 = vadd.f32 1.0, %v4331_v26  ;;  %v2821_v63 = vmul.f32 1.442695, %v2708_v10  ;;  %v2647_v21 = vadd.f32 %v5479_v36, %v5369_v16 }
 0x52b   : > { %v4335_v27 = vpop.eup %4334  ;;  %4354 = vrcp.f32 %v2887_v28  ;;  %v2888_v52 = vadd.f32 1.0, %v4333_v30  ;;  %v2653_v10 = vadd.f32 %v5497_v5, %v5369_v16 }
 0x52c   : > { %v4337_v32 = vpop.eup %4336  ;;  %v3675_v29 = vpack.c.bf16 %v4335_v27, %v5516_v48  ;;  %4356 = vrcp.f32 %v2889_v34  ;;  %v2643_v48 = vadd.f32 %v5469_v39, %v5369_v16  ;;  %v2817_v39 = vmul.f32 1.442695, %v2706_v60 }
 0x52d   : > { %v4339_v54 = vpop.eup %4338  ;;  %v3676_v18 = vpack.c.bf16 %v4337_v32, %v5518_v24  ;;  %4358 = vrcp.f32 %v2888_v52 }
 0x52e   : > { %v4341_v55 = vpop.eup %4340  ;;  %3183 = vst [vmem:[%s5423_s0 + $0x60] sm:$0xff] %v3675_v29  ;;  %4360 = vpow2.f32 %v2801_v4  ;;  %v2710_v14 = vsub.f32 0.0, %v2643_v48  ;;  %v2711_v29 = vsub.f32 0.0, %v2532_v56 }
 0x52f   : > { %v4343_v62 = vpop.eup %4342  ;;  %3184 = vst [vmem:[%s5423_s0 + $0x68] sm:$0xff] %v3676_v18  ;;  %4362 = vpow2.f32 %v2803_v22  ;;  %v2823_v22 = vmul.f32 1.442695, %v2709_v41  ;;  %v2714_v41 = vsub.f32 0.0, %v2647_v21 }
 0x530   : > { %v4345_v24 = vpop.eup %4344  ;;  %v3677_v0 = vpack.c.bf16 %v4343_v62, %v4339_v54  ;;  %4364 = vpow2.f32 %v2807_v2  ;;  %v2825_v3 = vmul.f32 1.442695, %v2710_v14  ;;  %v2713_v54 = vsub.f32 0.0, %v2645_v37 }
 0x531   : > { %v4347_v61 = vpop.eup %4346  ;;  %v3678_v38 = vpack.c.bf16 %v4345_v24, %v4341_v55  ;;  %4366 = vpow2.f32 %v2805_v6  ;;  %v2827_v58 = vmul.f32 1.442695, %v2711_v29  ;;  %v2712_v62 = vsub.f32 0.0, %v2534_v42 }
 0x532   : > { %v4349_v12 = vpop.eup %4348  ;;  %3185 = vst [vmem:[%s5423_s0 + $0x70] sm:$0xff] %v3677_v0  ;;  %4368 = vpow2.f32 %v2809_v31  ;;  %v2538_v31 = vadd.f32 %v5489_v25, %v5362_v19  ;;  %v2831_v24 = vmul.f32 1.442695, %v2713_v54  ;;  %v2651_v0 = vadd.f32 %v5491_v11, %v5364_v7 }
 0x533   : > { %v4351_v4 = vpop.eup %4350  ;;  %3186 = vst [vmem:[%s5423_s0 + $0x78] sm:$0xff] %v3678_v38  ;;  %4370 = vpow2.f32 %v2811_v49  ;;  %v2829_v14 = vmul.f32 1.442695, %v2712_v62  ;;  %v2542_v11 = vadd.f32 %v5502_v40, %v5362_v19  ;;  %v2718_v19 = vsub.f32 0.0, %v2653_v10 }
 0x534   : > { %v4353_v20 = vpop.eup %4352  ;;  %v3679_v35 = vpack.c.bf16 %v4351_v4, %v4347_v61  ;;  %4372 = vpow2.f32 %v2815_v51  ;;  %v2540_v61 = vadd.f32 %v5495_v33, %v5367_v15  ;;  %v2655_v33 = vadd.f32 %v5504_v44, %v5364_v7 }
 0x535   : > { %v4355_v23 = vpop.eup %4354  ;;  %v3680_v59 = vpack.c.bf16 %v4353_v20, %v4349_v12  ;;  %4374 = vpow2.f32 %v2813_v45  ;;  %v2715_v45 = vsub.f32 0.0, %v2538_v31  ;;  %v2717_v20 = vsub.f32 0.0, %v2651_v0 }
 0x536   : > { %v5554_v2 = vpop.eup %4356  ;;  %3187 = vst [vmem:[%s5423_s0 + $0x80] sm:$0xff] %v3679_v35  ;;  %4376 = vpow2.f32 %v2817_v39  ;;  %v2716_v5 = vsub.f32 0.0, %v2540_v61  ;;  %v2657_v40 = vadd.f32 %v5510_v8, %v5369_v16  ;;  %v2719_v44 = vsub.f32 0.0, %v2542_v11 }
 0x537   : > { %v4359_v26 = vpop.eup %4358  ;;  %3188 = vst [vmem:[%s5423_s0 + $0x88] sm:$0xff] %v3680_v59  ;;  %4378 = vpow2.f32 %v2819_v17  ;;  %v2835_v7 = vmul.f32 1.442695, %v2715_v45  ;;  %v2841_v16 = vmul.f32 1.442695, %v2718_v19 }
 0x538   : > { %v4361_v28 = vpop.eup %4360  ;;  %v3681_v6 = vpack.c.bf16 %v4359_v26, %v4355_v23  ;;  %4380 = vpow2.f32 %v2823_v22  ;;  %v2544_v23 = vadd.f32 %v5508_v53, %v5367_v15  ;;  %v2837_v56 = vmul.f32 1.442695, %v2716_v5 }
 0x539   : > { %v4363_v30 = vpop.eup %4362  ;;  %v2890_v34 = vadd.f32 1.0, %v4361_v28  ;;  %4382 = vpow2.f32 %v2821_v63  ;;  %v2833_v63 = vmul.f32 1.442695, %v2714_v41  ;;  %v2839_v28 = vmul.f32 1.442695, %v2717_v20 }
 0x53a   : > { %v4365_v1 = vpop.eup %4364  ;;  %3189 = vst [vmem:[%s5423_s0 + $0x90] sm:$0xff] %v3681_v6  ;;  %v2891_v27 = vadd.f32 1.0, %v4363_v30  ;;  %4384 = vpow2.f32 %v2825_v3  ;;  %v2721_v6 = vsub.f32 0.0, %v2655_v33  ;;  %v2720_v30 = vsub.f32 0.0, %v2544_v23 }
 0x53b   : > { %v4367_v52 = vpop.eup %4366  ;;  %4386 = vrcp.f32 %v2890_v34  ;;  %v2893_v46 = vadd.f32 1.0, %v4365_v1  ;;  %v2722_v8 = vsub.f32 0.0, %v2657_v40  ;;  %v2843_v1 = vmul.f32 1.442695, %v2719_v44 }
 0x53c   : > { %v4369_v9 = vpop.eup %4368  ;;  %4388 = vrcp.f32 %v2891_v27  ;;  %v2892_v32 = vadd.f32 1.0, %v4367_v52  ;;  %v2845_v29 = vmul.f32 1.442695, %v2720_v30 }
 0x53d   : > { %v4371_v13 = vpop.eup %4370  ;;  %4390 = vrcp.f32 %v2893_v46  ;;  %v2894_v50 = vadd.f32 1.0, %v4369_v9  ;;  %v2847_v46 = vmul.f32 1.442695, %v2721_v6 }
 0x53e   : > { %v4373_v18 = vpop.eup %4372  ;;  %4392 = vrcp.f32 %v2892_v32  ;;  %v2895_v47 = vadd.f32 1.0, %v4371_v13  ;;  %v2849_v13 = vmul.f32 1.442695, %v2722_v8 }
 0x53f   : > { %v4375_v43 = vpop.eup %4374  ;;  %4394 = vrcp.f32 %v2894_v50  ;;  %v2897_v55 = vadd.f32 1.0, %v4373_v18 }
 0x540   : > { %v4377_v60 = vpop.eup %4376  ;;  %4396 = vrcp.f32 %v2895_v47  ;;  %v2896_v48 = vadd.f32 1.0, %v4375_v43 }
 0x541   : > { %v4379_v49 = vpop.eup %4378  ;;  %4398 = vrcp.f32 %v2897_v55  ;;  %v2898_v57 = vadd.f32 1.0, %v4377_v60 }
 0x542   : > { %v4381_v51 = vpop.eup %4380  ;;  %4400 = vrcp.f32 %v2896_v48  ;;  %v2899_v36 = vadd.f32 1.0, %v4379_v49 }
 0x543   : > { %v4383_v25 = vpop.eup %4382  ;;  %4402 = vrcp.f32 %v2898_v57  ;;  %v2901_v38 = vadd.f32 1.0, %v4381_v51 }
 0x544   : > { %v4385_v12 = vpop.eup %4384  ;;  %4404 = vrcp.f32 %v2899_v36  ;;  %v2900_v39 = vadd.f32 1.0, %v4383_v25 }
 0x545   : > { %v4387_v4 = vpop.eup %4386  ;;  %4406 = vrcp.f32 %v2901_v38  ;;  %v2902_v17 = vadd.f32 1.0, %v4385_v12 }
 0x546   : > { %v4389_v35 = vpop.eup %4388  ;;  %v3682_v22 = vpack.c.bf16 %v4387_v4, %v5554_v2  ;;  %4408 = vrcp.f32 %v2900_v39 }
 0x547   : > { %v4391_v59 = vpop.eup %4390  ;;  %4410 = vrcp.f32 %v2902_v17 }
 0x548   : > { %v4393_v3 = vpop.eup %4392  ;;  %3190 = vst [vmem:[%s5423_s0 + $0x98] sm:$0xff] %v3682_v22  ;;  %4412 = vpow2.f32 %v2827_v58 }
 0x549   : > { %v4395_v26 = vpop.eup %4394  ;;  %v3683_v2 = vpack.c.bf16 %v4393_v3, %v4389_v35  ;;  %4414 = vpow2.f32 %v2831_v24 }
 0x54a   : > { %v4397_v15 = vpop.eup %4396  ;;  %v3684_v53 = vpack.c.bf16 %v4395_v26, %v4391_v59  ;;  %4416 = vpow2.f32 %v2829_v14 }
 0x54b   : > { %v4399_v34 = vpop.eup %4398  ;;  %3191 = vst [vmem:[%s5423_s0 + $0xa0] sm:$0xff] %v3683_v2  ;;  %4418 = vpow2.f32 %v2833_v63 }
 0x54c   : > { %v4401_v37 = vpop.eup %4400  ;;  %3192 = vst [vmem:[%s5423_s0 + $0xa8] sm:$0xff] %v3684_v53  ;;  %4420 = vpow2.f32 %v2835_v7 }
 0x54d   : > { %v4403_v27 = vpop.eup %4402  ;;  %v3685_v52 = vpack.c.bf16 %v4401_v37, %v4397_v15  ;;  %4422 = vpow2.f32 %v2839_v28 }
 0x54e   : > { %v4405_v9 = vpop.eup %4404  ;;  %v3686_v32 = vpack.c.bf16 %v4403_v27, %v4399_v34  ;;  %4424 = vpow2.f32 %v2837_v56 }
 0x54f   : > { %v4407_v42 = vpop.eup %4406  ;;  %3193 = vst [vmem:[%s5423_s0 + $0xb0] sm:$0xff] %v3685_v52  ;;  %4426 = vpow2.f32 %v2841_v16 }
 0x550   : > { %v4409_v50 = vpop.eup %4408  ;;  %3194 = vst [vmem:[%s5423_s0 + $0xb8] sm:$0xff] %v3686_v32  ;;  %4428 = vpow2.f32 %v2843_v1 }
 0x551   : > { %v4411_v54 = vpop.eup %4410  ;;  %v3687_v18 = vpack.c.bf16 %v4409_v50, %v4405_v9  ;;  %4430 = vpow2.f32 %v2847_v46 }
 0x552   : > { %v4413_v47 = vpop.eup %4412  ;;  %v3688_v21 = vpack.c.bf16 %v4411_v54, %v4407_v42  ;;  %4432 = vpow2.f32 %v2845_v29 }
 0x553   : > { %v4415_v43 = vpop.eup %4414  ;;  %3195 = vst [vmem:[%s5423_s0 + $0xc0] sm:$0xff] %v3687_v18  ;;  %v2903_v55 = vadd.f32 1.0, %v4413_v47  ;;  %4434 = vpow2.f32 %v2849_v13 }
 0x554   : > { %v4417_v31 = vpop.eup %4416  ;;  %3196 = vst [vmem:[%s5423_s0 + $0xc8] sm:$0xff] %v3688_v21  ;;  %v2905_v60 = vadd.f32 1.0, %v4415_v43 }
 0x555   : > { %v4419_v48 = vpop.eup %4418  ;;  %4436 = vrcp.f32 %v2903_v55  ;;  %v2904_v58 = vadd.f32 1.0, %v4417_v31 }
 0x556   : > { %v4421_v62 = vpop.eup %4420  ;;  %4438 = vrcp.f32 %v2905_v60  ;;  %v2906_v49 = vadd.f32 1.0, %v4419_v48 }
 0x557   : > { %v4423_v57 = vpop.eup %4422  ;;  %4440 = vrcp.f32 %v2904_v58  ;;  %v2907_v24 = vadd.f32 1.0, %v4421_v62 }
 0x558   : > { %v4425_v0 = vpop.eup %4424  ;;  %4442 = vrcp.f32 %v2906_v49  ;;  %v2909_v51 = vadd.f32 1.0, %v4423_v57 }
 0x559   : > { %v4427_v36 = vpop.eup %4426  ;;  %4444 = vrcp.f32 %v2907_v24  ;;  %v2908_v41 = vadd.f32 1.0, %v4425_v0 }
 0x55a   : > { %v4429_v61 = vpop.eup %4428  ;;  %4446 = vrcp.f32 %v2909_v51  ;;  %v2910_v25 = vadd.f32 1.0, %v4427_v36 }
 0x55b   : > { %v4431_v38 = vpop.eup %4430  ;;  %4448 = vrcp.f32 %v2908_v41  ;;  %v2911_v45 = vadd.f32 1.0, %v4429_v61 }
 0x55c   : > { %v4433_v10 = vpop.eup %4432  ;;  %4450 = vrcp.f32 %v2910_v25  ;;  %v2913_v12 = vadd.f32 1.0, %v4431_v38 }
 0x55d   : > { %v4435_v39 = vpop.eup %4434  ;;  %4452 = vrcp.f32 %v2911_v45  ;;  %v2912_v14 = vadd.f32 1.0, %v4433_v10 }
 0x55e   : > { %4454 = vrcp.f32 %v2913_v12  ;;  %v2914_v11 = vadd.f32 1.0, %v4435_v39 }
 0x55f   : > { %v4437_v4 = vpop.eup %4436  ;;  %4456 = vrcp.f32 %v2912_v14 }
 0x560   : > { %v4439_v17 = vpop.eup %4438  ;;  %4458 = vrcp.f32 %v2914_v11 }
 0x561   : > { %v4441_v20 = vpop.eup %4440 }
 0x562   : > { %v4443_v33 = vpop.eup %4442  ;;  %v3689_v35 = vpack.c.bf16 %v4441_v20, %v4437_v4 }
 0x563   : > { %v4445_v22 = vpop.eup %4444  ;;  %v3690_v5 = vpack.c.bf16 %v4443_v33, %v4439_v17 }
 0x564   : > { %v4447_v23 = vpop.eup %4446  ;;  %3197 = vst [vmem:[%s5423_s0 + $0xd0] sm:$0xff] %v3689_v35 }
 0x565   : > { %v4449_v59 = vpop.eup %4448  ;;  %3198 = vst [vmem:[%s5423_s0 + $0xd8] sm:$0xff] %v3690_v5 }
 0x566   : > { %v4451_v63 = vpop.eup %4450  ;;  %v3691_v19 = vpack.c.bf16 %v4449_v59, %v4445_v22 }
 0x567   : > { %v4453_v40 = vpop.eup %4452  ;;  %v3692_v3 = vpack.c.bf16 %v4451_v63, %v4447_v23 }
 0x568   : > { %v4455_v7 = vpop.eup %4454  ;;  %3199 = vst [vmem:[%s5423_s0 + $0xe0] sm:$0xff] %v3691_v19 }
 0x569   : > { %v4457_v44 = vpop.eup %4456  ;;  %3200 = vst [vmem:[%s5423_s0 + $0xe8] sm:$0xff] %v3692_v3 }
 0x56a   : > { %v4459_v26 = vpop.eup %4458  ;;  %v3693_v2 = vpack.c.bf16 %v4457_v44, %v4453_v40 }
 0x56b   : > { %v3694_v28 = vpack.c.bf16 %v4459_v26, %v4455_v7 }
 0x56c   : > { %3201 = vst [vmem:[%s5423_s0 + $0xf0] sm:$0xff] %v3693_v2 }
 0x56d   : > { %3202 = vst [vmem:[%s5423_s0 + $0xf8] sm:$0xff] %v3694_v28 }
 0x56e   : > { %4645 = shalt.err (!%p4642_p11)
}
 0x56f   : > { %s4646_s2 = scalar_lea.hbm %s5600_s11, 4096  ;;  %s4650_s12 = scalar_lea.hbm %s5655_s7, 8192 }
 0x570   : > { %p4647_p7 = scmp.ne.s32.totalorder %s5600_s11, %s4646_s2  ;;  %p4651_p2 = scmp.lt.u32.totalorder %s5600_s11, %s5655_s7 }
 0x571   : > { %p4652_p13 = scmp.lt.u32.totalorder %s4650_s12, %s4646_s2  ;;  %p4654_p4 = scmp.lt.u32.totalorder %s4646_s2, %s5600_s11 }
 0x572   : > { %p4648_p12 = pnand %p4647_p7, %p4949_p3 }
 0x573   : > { %p4653_p0 = por %p4652_p13, %p4651_p2 }
 0x574   : > { %p4649_p1 = pneg %p4648_p12 }
 0x575   : > { %p4655_p6 = por %p4654_p4, %p4653_p0 }
 0x577   : > { %p4656_p10 = pnand %p4655_p6, %p4649_p1 }
 0x579   : > { %4659 = shalt.err (!%p4656_p10)
}
 0x57a   : > { %s4728_s18 = smov 256   ;;  %s4729_s25 = smov 16  }
 0x57b   : > { %3781 = dma.vmem_to_hbm [thread:$0]  (%p4949_p3), %s5602_s3, 4096, %s5600_s11, %s3204_s9, %s4728_s18, %s4728_s18, %s4729_s25  }
 0x57c PF: > { %s5697_s0 = sld [smem:[#allocation20_spill]]  ;;  %s5698_s26 = sld [smem:[#allocation21_spill]] }
 0x57d   : > { %p5700_p9 = scmp.ge.s32.totalorder %s4714_s30, 2 }
 0x582   : > { %s3243_s13 = sand.u32 1, %s5697_s0   ;;  %p5699_p5 = scmp.ne.s32.totalorder %s5698_s26, 0 }
 0x583   : > { %s3244_s17 = scalar_lea.sflag [#allocation4], %s3243_s13 }
 0x584   : > { %p3804_p8 = pnand %p5700_p9, %p5699_p5 }
 0x586   : > { %4697 = dma.done.wait (!%p3804_p8), %s3244_s17, 4096  }
 0x587   : > { %4699 = vsyncadd (!%p3804_p8), %s3244_s17, 4294963200  ;;  %p27_p11 = scmp.ge.s32.totalorder %s4936_s23, 4   ;;  %s5701_s27 = smov %s4706_s28 }
 0x588   : > { %s5702_s28 = smov %s4710_s29  ;;  %s5703_s29 = smov %s4945_s10 }
 0x589   : > { %s5704_s30 = smov %s4936_s23  ;;  %29 = sbr.rel (!%p27_p11) target bundleno = 14 (0xe), region = 134 }
 0x590   :  { %3258 = vsyncpa [#allocation3], 1 }
 0x591   :  { %3260 = vsyncpa [#allocation3 + $0x1], 1 }
 0x592   :  { %3261 = vsyncpa [#allocation6], 1 }
 0x593   :  { %3263 = vsyncpa [#allocation6 + $0x1], 1 }
 0x594   :  { %3264 = vsyncpa [#allocation9], 1 }
 0x595   :  { %3265 = vsyncpa [#allocation12], 1 }
 0x596   :  { %3266 = vsyncpa [#allocation4], 1 }
 0x597   :  { %3268 = vsyncpa [#allocation4 + $0x1], 1 }

</bundles_post_ra>
